<compile_context>
chip_gen: v6e
topology: v6e:2x2x1
jax: 0.10.0
libtpu: 0.0.40
codegen_flags: <defaults>
</compile_context>

<pallas_src>
import jax
import jax.numpy as jnp
from jax.experimental import pallas as pl
from jax.experimental.pallas import tpu as pltpu

_SLAB = 8          # hidden rows per accumulation slab (= sublane granule)
_MAX_CHUNK = 512   # lane chunk processed per inner-loop iteration


def valuenet_kernel(xt_ref, w1_ref, b1_ref, w2_ref, b2_ref, o_ref):
    # xt_ref: (state_dim, bm)        activations, batch along lanes
    # w1_ref: (hidden_p, state_dim)  fc1.weight (PyTorch layout, rows padded to 8)
    # b1_ref: (hidden_p, 1)          fc1.bias as a column
    # w2_ref: (hidden_p, 1)          fc2.weight transposed to a column
    # b2_ref: (1, 1) in SMEM         fc2.bias scalar
    # o_ref : (1, bm)                lane-dense output row
    state_dim, bm = xt_ref.shape
    hidden_p = w1_ref.shape[0]
    n_slabs = hidden_p // _SLAB

    # Largest lane chunk (multiple of 128) dividing bm, capped at _MAX_CHUNK so
    # the live vreg set stays small regardless of how big the batch tile is.
    chunk = bm
    for c in (_MAX_CHUNK, 256, 128):
        if bm % c == 0:
            chunk = c
            break
    n_chunks = bm // chunk

    b2 = b2_ref[0, 0]

    @pl.loop(0, n_chunks)
    def _chunk(ci):
        lane0 = pl.multiple_of(ci * chunk, chunk)
        xt = xt_ref[:, pl.ds(lane0, chunk)]                     # (state_dim, chunk)
        # Hoist the sublane broadcast of each input row out of the slab loop
        # (broadcast_in_dim is not CSE'd if left inside the loop body).
        xb = [jnp.broadcast_to(xt[i:i + 1, :], (_SLAB, chunk))
              for i in range(state_dim)]

        def slab(s, acc8):
            r = pl.multiple_of(s * _SLAB, _SLAB)
            w1_s = w1_ref[pl.ds(r, _SLAB), :]                   # (SLAB, state_dim)
            b1_s = b1_ref[pl.ds(r, _SLAB), :]                   # (SLAB, 1)
            w2_s = w2_ref[pl.ds(r, _SLAB), :]                   # (SLAB, 1)
            # fc1 for this slab: broadcast-FMA over the (tiny) input dim.
            h = b1_s + w1_s[:, 0:1] * xb[0]                     # (SLAB, chunk)
            for i in range(1, state_dim):
                h = h + w1_s[:, i:i + 1] * xb[i]
            h = jnp.maximum(h, 0.0)                             # ReLU
            # fc2 contribution; sublane reduction deferred to after the loop.
            return acc8 + h * w2_s

        acc8 = jax.lax.fori_loop(0, n_slabs, slab,
                                 jnp.zeros((_SLAB, chunk), jnp.float32),
                                 unroll=True)
        v = jnp.sum(acc8, axis=0, keepdims=True) + b2           # (1, chunk)
        o_ref[:, pl.ds(lane0, chunk)] = v


def _round_up(n, m):
    return ((n + m - 1) // m) * m


def value_net_t(xt, w1, b1, w2, b2, *, bm_max=2048):
    """ValueNet forward on pre-transposed activations.

    xt: (state_dim, B) f32  -- batch on the trailing (lane) axis
    w1: (hidden, state_dim), b1: (hidden,)   -- PyTorch fc1.{weight,bias}
    w2: (1, hidden),         b2: (1,)        -- PyTorch fc2.{weight,bias}
    returns (B, 1) f32
    """
    state_dim, B = xt.shape
    hidden = w1.shape[0]
    bm_max = max(128, _round_up(bm_max, 128))

    # Pad hidden to a multiple of the slab size; zero rows are exact no-ops
    # (relu(0 + 0*x) * 0 == 0).
    hidden_p = _round_up(hidden, _SLAB)
    b1c = b1.reshape(hidden, 1)
    w2c = w2.reshape(hidden, 1)
    if hidden_p != hidden:
        pad = ((0, hidden_p - hidden), (0, 0))
        w1 = jnp.pad(w1, pad)
        b1c = jnp.pad(b1c, pad)
        w2c = jnp.pad(w2c, pad)
    b2c = b2.reshape(1, 1)

    # Tile selection: big lane-dense tiles amortize per-grid-step overhead, but
    # keep an even number (>=2) of parallel steps once B > 128 so v7x's two
    # TensorCores both get work.  Small B pads to one 128-lane tile so every
    # load/store is unmasked.
    if B <= 128:
        bm = 128
    else:
        nt = max(2, pl.cdiv(B, bm_max))
        nt += nt % 2
        bm = min(bm_max, _round_up(pl.cdiv(B, nt), 128))
    ntiles = pl.cdiv(B, bm)
    b_pad = ntiles * bm

    if b_pad != B:
        xt = jnp.pad(xt, ((0, 0), (0, b_pad - B)))

    out = pl.pallas_call(
        valuenet_kernel,
        out_shape=jax.ShapeDtypeStruct((1, b_pad), jnp.float32),
        grid=(ntiles,),
        in_specs=[
            # activations: tiled over batch (lanes)
            pl.BlockSpec((state_dim, bm), lambda i: (0, i)),
            # parameters: constant index_map -> resident in VMEM across steps
            pl.BlockSpec((hidden_p, state_dim), lambda i: (0, 0)),
            pl.BlockSpec((hidden_p, 1), lambda i: (0, 0)),
            pl.BlockSpec((hidden_p, 1), lambda i: (0, 0)),
            # fc2 bias: scalar in SMEM (no padded VMEM tile)
            pl.BlockSpec(memory_space=pltpu.MemorySpace.SMEM),
        ],
        out_specs=pl.BlockSpec((1, bm), lambda i: (0, i)),
        compiler_params=pltpu.CompilerParams(
            dimension_semantics=("parallel",),
            vmem_limit_bytes=32 * 1024 * 1024),
    )(xt, w1, b1c, w2c, b2c)

    # (1, b_pad) lane-dense row -> (B, 1): reshape preserves element order and
    # [:B] is a cheap view of the padded slab.
    return out.reshape(b_pad, 1)[:B]


def value_net(x, w1, b1, w2, b2, *, bm_max=2048):
    """ValueNet forward with the PyTorch (B, state_dim) input layout."""
    # TODO(synk): callers that can hand x over already as (state_dim, B) should
    # call value_net_t directly and skip this wrapper-side HBM transpose pass.
    return value_net_t(x.T, w1, b1, w2, b2, bm_max=bm_max)


def init_params(key, state_dim, hidden_dim):
    # PyTorch-Linear-style uniform(-1/sqrt(fan_in), 1/sqrt(fan_in)), stored in
    # native PyTorch layouts: weight (out, in), bias (out,).
    k1, k2, k3, k4 = jax.random.split(key, 4)
    bound1 = 1.0 / jnp.sqrt(jnp.float32(state_dim))
    bound2 = 1.0 / jnp.sqrt(jnp.float32(hidden_dim))
    w1 = jax.random.uniform(k1, (hidden_dim, state_dim), jnp.float32,
                            -bound1, bound1)
    b1 = jax.random.uniform(k2, (hidden_dim,), jnp.float32, -bound1, bound1)
    w2 = jax.random.uniform(k3, (1, hidden_dim), jnp.float32, -bound2, bound2)
    b2 = jax.random.uniform(k4, (1,), jnp.float32, -bound2, bound2)
    return w1, b1, w2, b2


if __name__ == "__main__":
    state_dim = 4      # CartPole-v1 observation space
    hidden_dim = 128
    batch = 16

    key = jax.random.PRNGKey(0)
    kx, kp = jax.random.split(key)
    x = jax.random.normal(kx, (batch, state_dim), jnp.float32)
    w1, b1, w2, b2 = init_params(kp, state_dim, hidden_dim)

    out = value_net(x, w1, b1, w2, b2)
    out = jax.block_until_ready(out)

    # Pure-JAX reference (same math as the PyTorch forward).
    ref = jnp.maximum(x @ w1.T + b1, 0.0) @ w2.T + b2
    assert out.shape == (batch, 1)
    assert jnp.allclose(out, ref, atol=1e-5, rtol=1e-5)

    print("KERNEL_OK")
</pallas_src>

<mosaic_0001>
module attributes {stable_mosaic.version = 11 : i64} {
  func.func @valuenet_kernel(%arg0: i32, %arg1: memref<4x128xf32, #tpu.memory_space<vmem>>, %arg2: memref<128x4xf32, #tpu.memory_space<vmem>>, %arg3: memref<128x1xf32, #tpu.memory_space<vmem>>, %arg4: memref<128x1xf32, #tpu.memory_space<vmem>>, %arg5: memref<1x1xf32, #tpu.memory_space<smem>>, %arg6: memref<1x128xf32, #tpu.memory_space<vmem>>) attributes {dimension_semantics = [#tpu.dimension_semantics<parallel>], iteration_bounds = array<i64: 1>, scalar_prefetch = 0 : i64, scratch_operands = 0 : i64, tpu.core_type = #tpu.core_type<tc>, window_params = [{transform_indices = @transform_0, window_bounds = array<i64: 4, 128>}, {pipeline_mode = #tpu.pipeline_mode<synchronous>, transform_indices = @transform_1, window_bounds = array<i64: 128, 4>}, {pipeline_mode = #tpu.pipeline_mode<synchronous>, transform_indices = @transform_2, window_bounds = array<i64: 128, 1>}, {pipeline_mode = #tpu.pipeline_mode<synchronous>, transform_indices = @transform_3, window_bounds = array<i64: 128, 1>}, {transform_indices = @transform_4, window_bounds = array<i64: 1, 1>}, {transform_indices = @transform_5, window_bounds = array<i64: 1, 128>}]} {
    %c0 = arith.constant 0 : index
    %c0_0 = arith.constant 0 : index
    %0 = memref.load %arg5[%c0, %c0_0] : memref<1x1xf32, #tpu.memory_space<smem>>
    %c0_i32 = arith.constant 0 : i32
    %c1_i32 = arith.constant 1 : i32
    %1 = arith.muli %c0_i32, %c1_i32 : i32
    %c0_i32_1 = arith.constant 0 : i32
    %2 = arith.addi %c0_i32_1, %1 : i32
    %c128_i32 = arith.constant 128 : i32
    %3 = arith.muli %2, %c128_i32 : i32
    %4 = tpu.assume_multiple %3, 128 : i32
    %c0_2 = arith.constant 0 : index
    %5 = arith.index_cast %4 : i32 to index
    %6 = vector.load %arg1[%c0_2, %5] : memref<4x128xf32, #tpu.memory_space<vmem>>, vector<4x128xf32>
    %7 = vector.extract_strided_slice %6 {offsets = [0, 0], sizes = [1, 128], strides = [1, 1]} : vector<4x128xf32> to vector<1x128xf32>
    %8 = vector.shape_cast %7 : vector<1x128xf32> to vector<1x128xf32>
    %9 = vector.broadcast %8 : vector<1x128xf32> to vector<8x128xf32>
    %10 = vector.extract_strided_slice %6 {offsets = [1, 0], sizes = [1, 128], strides = [1, 1]} : vector<4x128xf32> to vector<1x128xf32>
    %11 = vector.shape_cast %10 : vector<1x128xf32> to vector<1x128xf32>
    %12 = vector.broadcast %11 : vector<1x128xf32> to vector<8x128xf32>
    %13 = vector.extract_strided_slice %6 {offsets = [2, 0], sizes = [1, 128], strides = [1, 1]} : vector<4x128xf32> to vector<1x128xf32>
    %14 = vector.shape_cast %13 : vector<1x128xf32> to vector<1x128xf32>
    %15 = vector.broadcast %14 : vector<1x128xf32> to vector<8x128xf32>
    %16 = vector.extract_strided_slice %6 {offsets = [3, 0], sizes = [1, 128], strides = [1, 1]} : vector<4x128xf32> to vector<1x128xf32>
    %17 = vector.shape_cast %16 : vector<1x128xf32> to vector<1x128xf32>
    %18 = vector.broadcast %17 : vector<1x128xf32> to vector<8x128xf32>
    %cst = arith.constant 0.000000e+00 : f32
    %19 = vector.broadcast %cst : f32 to vector<8x128xf32>
    %c0_i32_3 = arith.constant 0 : i32
    %c8_i32 = arith.constant 8 : i32
    %20 = arith.muli %c0_i32_3, %c8_i32 : i32
    %21 = tpu.assume_multiple %20, 8 : i32
    %22 = arith.index_cast %21 : i32 to index
    %c0_4 = arith.constant 0 : index
    %23 = vector.load %arg2[%22, %c0_4] : memref<128x4xf32, #tpu.memory_space<vmem>>, vector<8x4xf32>
    %24 = arith.index_cast %21 : i32 to index
    %c0_5 = arith.constant 0 : index
    %25 = vector.load %arg3[%24, %c0_5] : memref<128x1xf32, #tpu.memory_space<vmem>>, vector<8x1xf32>
    %26 = arith.index_cast %21 : i32 to index
    %c0_6 = arith.constant 0 : index
    %27 = vector.load %arg4[%26, %c0_6] : memref<128x1xf32, #tpu.memory_space<vmem>>, vector<8x1xf32>
    %28 = vector.extract_strided_slice %23 {offsets = [0, 0], sizes = [8, 1], strides = [1, 1]} : vector<8x4xf32> to vector<8x1xf32>
    %29 = vector.broadcast %28 : vector<8x1xf32> to vector<8x128xf32>
    %30 = arith.mulf %29, %9 : vector<8x128xf32>
    %31 = vector.broadcast %25 : vector<8x1xf32> to vector<8x128xf32>
    %32 = arith.addf %31, %30 : vector<8x128xf32>
    %33 = vector.extract_strided_slice %23 {offsets = [0, 1], sizes = [8, 1], strides = [1, 1]} : vector<8x4xf32> to vector<8x1xf32>
    %34 = vector.broadcast %33 : vector<8x1xf32> to vector<8x128xf32>
    %35 = arith.mulf %34, %12 : vector<8x128xf32>
    %36 = arith.addf %32, %35 : vector<8x128xf32>
    %37 = vector.extract_strided_slice %23 {offsets = [0, 2], sizes = [8, 1], strides = [1, 1]} : vector<8x4xf32> to vector<8x1xf32>
    %38 = vector.broadcast %37 : vector<8x1xf32> to vector<8x128xf32>
    %39 = arith.mulf %38, %15 : vector<8x128xf32>
    %40 = arith.addf %36, %39 : vector<8x128xf32>
    %41 = vector.extract_strided_slice %23 {offsets = [0, 3], sizes = [8, 1], strides = [1, 1]} : vector<8x4xf32> to vector<8x1xf32>
    %42 = vector.broadcast %41 : vector<8x1xf32> to vector<8x128xf32>
    %43 = arith.mulf %42, %18 : vector<8x128xf32>
    %44 = arith.addf %40, %43 : vector<8x128xf32>
    %cst_7 = arith.constant 0.000000e+00 : f32
    %45 = vector.broadcast %cst_7 : f32 to vector<8x128xf32>
    %46 = arith.maximumf %44, %45 : vector<8x128xf32>
    %47 = vector.broadcast %27 : vector<8x1xf32> to vector<8x128xf32>
    %48 = arith.mulf %46, %47 : vector<8x128xf32>
    %49 = arith.addf %19, %48 : vector<8x128xf32>
    %c1_i32_8 = arith.constant 1 : i32
    %c8_i32_9 = arith.constant 8 : i32
    %50 = arith.muli %c1_i32_8, %c8_i32_9 : i32
    %51 = tpu.assume_multiple %50, 8 : i32
    %52 = arith.index_cast %51 : i32 to index
    %c0_10 = arith.constant 0 : index
    %53 = vector.load %arg2[%52, %c0_10] : memref<128x4xf32, #tpu.memory_space<vmem>>, vector<8x4xf32>
    %54 = arith.index_cast %51 : i32 to index
    %c0_11 = arith.constant 0 : index
    %55 = vector.load %arg3[%54, %c0_11] : memref<128x1xf32, #tpu.memory_space<vmem>>, vector<8x1xf32>
    %56 = arith.index_cast %51 : i32 to index
    %c0_12 = arith.constant 0 : index
    %57 = vector.load %arg4[%56, %c0_12] : memref<128x1xf32, #tpu.memory_space<vmem>>, vector<8x1xf32>
    %58 = vector.extract_strided_slice %53 {offsets = [0, 0], sizes = [8, 1], strides = [1, 1]} : vector<8x4xf32> to vector<8x1xf32>
    %59 = vector.broadcast %58 : vector<8x1xf32> to vector<8x128xf32>
    %60 = arith.mulf %59, %9 : vector<8x128xf32>
    %61 = vector.broadcast %55 : vector<8x1xf32> to vector<8x128xf32>
    %62 = arith.addf %61, %60 : vector<8x128xf32>
    %63 = vector.extract_strided_slice %53 {offsets = [0, 1], sizes = [8, 1], strides = [1, 1]} : vector<8x4xf32> to vector<8x1xf32>
    %64 = vector.broadcast %63 : vector<8x1xf32> to vector<8x128xf32>
    %65 = arith.mulf %64, %12 : vector<8x128xf32>
    %66 = arith.addf %62, %65 : vector<8x128xf32>
    %67 = vector.extract_strided_slice %53 {offsets = [0, 2], sizes = [8, 1], strides = [1, 1]} : vector<8x4xf32> to vector<8x1xf32>
    %68 = vector.broadcast %67 : vector<8x1xf32> to vector<8x128xf32>
    %69 = arith.mulf %68, %15 : vector<8x128xf32>
    %70 = arith.addf %66, %69 : vector<8x128xf32>
    %71 = vector.extract_strided_slice %53 {offsets = [0, 3], sizes = [8, 1], strides = [1, 1]} : vector<8x4xf32> to vector<8x1xf32>
    %72 = vector.broadcast %71 : vector<8x1xf32> to vector<8x128xf32>
    %73 = arith.mulf %72, %18 : vector<8x128xf32>
    %74 = arith.addf %70, %73 : vector<8x128xf32>
    %cst_13 = arith.constant 0.000000e+00 : f32
    %75 = vector.broadcast %cst_13 : f32 to vector<8x128xf32>
    %76 = arith.maximumf %74, %75 : vector<8x128xf32>
    %77 = vector.broadcast %57 : vector<8x1xf32> to vector<8x128xf32>
    %78 = arith.mulf %76, %77 : vector<8x128xf32>
    %79 = arith.addf %49, %78 : vector<8x128xf32>
    %c2_i32 = arith.constant 2 : i32
    %c8_i32_14 = arith.constant 8 : i32
    %80 = arith.muli %c2_i32, %c8_i32_14 : i32
    %81 = tpu.assume_multiple %80, 8 : i32
    %82 = arith.index_cast %81 : i32 to index
    %c0_15 = arith.constant 0 : index
    %83 = vector.load %arg2[%82, %c0_15] : memref<128x4xf32, #tpu.memory_space<vmem>>, vector<8x4xf32>
    %84 = arith.index_cast %81 : i32 to index
    %c0_16 = arith.constant 0 : index
    %85 = vector.load %arg3[%84, %c0_16] : memref<128x1xf32, #tpu.memory_space<vmem>>, vector<8x1xf32>
    %86 = arith.index_cast %81 : i32 to index
    %c0_17 = arith.constant 0 : index
    %87 = vector.load %arg4[%86, %c0_17] : memref<128x1xf32, #tpu.memory_space<vmem>>, vector<8x1xf32>
    %88 = vector.extract_strided_slice %83 {offsets = [0, 0], sizes = [8, 1], strides = [1, 1]} : vector<8x4xf32> to vector<8x1xf32>
    %89 = vector.broadcast %88 : vector<8x1xf32> to vector<8x128xf32>
    %90 = arith.mulf %89, %9 : vector<8x128xf32>
    %91 = vector.broadcast %85 : vector<8x1xf32> to vector<8x128xf32>
    %92 = arith.addf %91, %90 : vector<8x128xf32>
    %93 = vector.extract_strided_slice %83 {offsets = [0, 1], sizes = [8, 1], strides = [1, 1]} : vector<8x4xf32> to vector<8x1xf32>
    %94 = vector.broadcast %93 : vector<8x1xf32> to vector<8x128xf32>
    %95 = arith.mulf %94, %12 : vector<8x128xf32>
    %96 = arith.addf %92, %95 : vector<8x128xf32>
    %97 = vector.extract_strided_slice %83 {offsets = [0, 2], sizes = [8, 1], strides = [1, 1]} : vector<8x4xf32> to vector<8x1xf32>
    %98 = vector.broadcast %97 : vector<8x1xf32> to vector<8x128xf32>
    %99 = arith.mulf %98, %15 : vector<8x128xf32>
    %100 = arith.addf %96, %99 : vector<8x128xf32>
    %101 = vector.extract_strided_slice %83 {offsets = [0, 3], sizes = [8, 1], strides = [1, 1]} : vector<8x4xf32> to vector<8x1xf32>
    %102 = vector.broadcast %101 : vector<8x1xf32> to vector<8x128xf32>
    %103 = arith.mulf %102, %18 : vector<8x128xf32>
    %104 = arith.addf %100, %103 : vector<8x128xf32>
    %cst_18 = arith.constant 0.000000e+00 : f32
    %105 = vector.broadcast %cst_18 : f32 to vector<8x128xf32>
    %106 = arith.maximumf %104, %105 : vector<8x128xf32>
    %107 = vector.broadcast %87 : vector<8x1xf32> to vector<8x128xf32>
    %108 = arith.mulf %106, %107 : vector<8x128xf32>
    %109 = arith.addf %79, %108 : vector<8x128xf32>
    %c3_i32 = arith.constant 3 : i32
    %c8_i32_19 = arith.constant 8 : i32
    %110 = arith.muli %c3_i32, %c8_i32_19 : i32
    %111 = tpu.assume_multiple %110, 8 : i32
    %112 = arith.index_cast %111 : i32 to index
    %c0_20 = arith.constant 0 : index
    %113 = vector.load %arg2[%112, %c0_20] : memref<128x4xf32, #tpu.memory_space<vmem>>, vector<8x4xf32>
    %114 = arith.index_cast %111 : i32 to index
    %c0_21 = arith.constant 0 : index
    %115 = vector.load %arg3[%114, %c0_21] : memref<128x1xf32, #tpu.memory_space<vmem>>, vector<8x1xf32>
    %116 = arith.index_cast %111 : i32 to index
    %c0_22 = arith.constant 0 : index
    %117 = vector.load %arg4[%116, %c0_22] : memref<128x1xf32, #tpu.memory_space<vmem>>, vector<8x1xf32>
    %118 = vector.extract_strided_slice %113 {offsets = [0, 0], sizes = [8, 1], strides = [1, 1]} : vector<8x4xf32> to vector<8x1xf32>
    %119 = vector.broadcast %118 : vector<8x1xf32> to vector<8x128xf32>
    %120 = arith.mulf %119, %9 : vector<8x128xf32>
    %121 = vector.broadcast %115 : vector<8x1xf32> to vector<8x128xf32>
    %122 = arith.addf %121, %120 : vector<8x128xf32>
    %123 = vector.extract_strided_slice %113 {offsets = [0, 1], sizes = [8, 1], strides = [1, 1]} : vector<8x4xf32> to vector<8x1xf32>
    %124 = vector.broadcast %123 : vector<8x1xf32> to vector<8x128xf32>
    %125 = arith.mulf %124, %12 : vector<8x128xf32>
    %126 = arith.addf %122, %125 : vector<8x128xf32>
    %127 = vector.extract_strided_slice %113 {offsets = [0, 2], sizes = [8, 1], strides = [1, 1]} : vector<8x4xf32> to vector<8x1xf32>
    %128 = vector.broadcast %127 : vector<8x1xf32> to vector<8x128xf32>
    %129 = arith.mulf %128, %15 : vector<8x128xf32>
    %130 = arith.addf %126, %129 : vector<8x128xf32>
    %131 = vector.extract_strided_slice %113 {offsets = [0, 3], sizes = [8, 1], strides = [1, 1]} : vector<8x4xf32> to vector<8x1xf32>
    %132 = vector.broadcast %131 : vector<8x1xf32> to vector<8x128xf32>
    %133 = arith.mulf %132, %18 : vector<8x128xf32>
    %134 = arith.addf %130, %133 : vector<8x128xf32>
    %cst_23 = arith.constant 0.000000e+00 : f32
    %135 = vector.broadcast %cst_23 : f32 to vector<8x128xf32>
    %136 = arith.maximumf %134, %135 : vector<8x128xf32>
    %137 = vector.broadcast %117 : vector<8x1xf32> to vector<8x128xf32>
    %138 = arith.mulf %136, %137 : vector<8x128xf32>
    %139 = arith.addf %109, %138 : vector<8x128xf32>
    %c4_i32 = arith.constant 4 : i32
    %c8_i32_24 = arith.constant 8 : i32
    %140 = arith.muli %c4_i32, %c8_i32_24 : i32
    %141 = tpu.assume_multiple %140, 8 : i32
    %142 = arith.index_cast %141 : i32 to index
    %c0_25 = arith.constant 0 : index
    %143 = vector.load %arg2[%142, %c0_25] : memref<128x4xf32, #tpu.memory_space<vmem>>, vector<8x4xf32>
    %144 = arith.index_cast %141 : i32 to index
    %c0_26 = arith.constant 0 : index
    %145 = vector.load %arg3[%144, %c0_26] : memref<128x1xf32, #tpu.memory_space<vmem>>, vector<8x1xf32>
    %146 = arith.index_cast %141 : i32 to index
    %c0_27 = arith.constant 0 : index
    %147 = vector.load %arg4[%146, %c0_27] : memref<128x1xf32, #tpu.memory_space<vmem>>, vector<8x1xf32>
    %148 = vector.extract_strided_slice %143 {offsets = [0, 0], sizes = [8, 1], strides = [1, 1]} : vector<8x4xf32> to vector<8x1xf32>
    %149 = vector.broadcast %148 : vector<8x1xf32> to vector<8x128xf32>
    %150 = arith.mulf %149, %9 : vector<8x128xf32>
    %151 = vector.broadcast %145 : vector<8x1xf32> to vector<8x128xf32>
    %152 = arith.addf %151, %150 : vector<8x128xf32>
    %153 = vector.extract_strided_slice %143 {offsets = [0, 1], sizes = [8, 1], strides = [1, 1]} : vector<8x4xf32> to vector<8x1xf32>
    %154 = vector.broadcast %153 : vector<8x1xf32> to vector<8x128xf32>
    %155 = arith.mulf %154, %12 : vector<8x128xf32>
    %156 = arith.addf %152, %155 : vector<8x128xf32>
    %157 = vector.extract_strided_slice %143 {offsets = [0, 2], sizes = [8, 1], strides = [1, 1]} : vector<8x4xf32> to vector<8x1xf32>
    %158 = vector.broadcast %157 : vector<8x1xf32> to vector<8x128xf32>
    %159 = arith.mulf %158, %15 : vector<8x128xf32>
    %160 = arith.addf %156, %159 : vector<8x128xf32>
    %161 = vector.extract_strided_slice %143 {offsets = [0, 3], sizes = [8, 1], strides = [1, 1]} : vector<8x4xf32> to vector<8x1xf32>
    %162 = vector.broadcast %161 : vector<8x1xf32> to vector<8x128xf32>
    %163 = arith.mulf %162, %18 : vector<8x128xf32>
    %164 = arith.addf %160, %163 : vector<8x128xf32>
    %cst_28 = arith.constant 0.000000e+00 : f32
    %165 = vector.broadcast %cst_28 : f32 to vector<8x128xf32>
    %166 = arith.maximumf %164, %165 : vector<8x128xf32>
    %167 = vector.broadcast %147 : vector<8x1xf32> to vector<8x128xf32>
    %168 = arith.mulf %166, %167 : vector<8x128xf32>
    %169 = arith.addf %139, %168 : vector<8x128xf32>
    %c5_i32 = arith.constant 5 : i32
    %c8_i32_29 = arith.constant 8 : i32
    %170 = arith.muli %c5_i32, %c8_i32_29 : i32
    %171 = tpu.assume_multiple %170, 8 : i32
    %172 = arith.index_cast %171 : i32 to index
    %c0_30 = arith.constant 0 : index
    %173 = vector.load %arg2[%172, %c0_30] : memref<128x4xf32, #tpu.memory_space<vmem>>, vector<8x4xf32>
    %174 = arith.index_cast %171 : i32 to index
    %c0_31 = arith.constant 0 : index
    %175 = vector.load %arg3[%174, %c0_31] : memref<128x1xf32, #tpu.memory_space<vmem>>, vector<8x1xf32>
    %176 = arith.index_cast %171 : i32 to index
    %c0_32 = arith.constant 0 : index
    %177 = vector.load %arg4[%176, %c0_32] : memref<128x1xf32, #tpu.memory_space<vmem>>, vector<8x1xf32>
    %178 = vector.extract_strided_slice %173 {offsets = [0, 0], sizes = [8, 1], strides = [1, 1]} : vector<8x4xf32> to vector<8x1xf32>
    %179 = vector.broadcast %178 : vector<8x1xf32> to vector<8x128xf32>
    %180 = arith.mulf %179, %9 : vector<8x128xf32>
    %181 = vector.broadcast %175 : vector<8x1xf32> to vector<8x128xf32>
    %182 = arith.addf %181, %180 : vector<8x128xf32>
    %183 = vector.extract_strided_slice %173 {offsets = [0, 1], sizes = [8, 1], strides = [1, 1]} : vector<8x4xf32> to vector<8x1xf32>
    %184 = vector.broadcast %183 : vector<8x1xf32> to vector<8x128xf32>
    %185 = arith.mulf %184, %12 : vector<8x128xf32>
    %186 = arith.addf %182, %185 : vector<8x128xf32>
    %187 = vector.extract_strided_slice %173 {offsets = [0, 2], sizes = [8, 1], strides = [1, 1]} : vector<8x4xf32> to vector<8x1xf32>
    %188 = vector.broadcast %187 : vector<8x1xf32> to vector<8x128xf32>
    %189 = arith.mulf %188, %15 : vector<8x128xf32>
    %190 = arith.addf %186, %189 : vector<8x128xf32>
    %191 = vector.extract_strided_slice %173 {offsets = [0, 3], sizes = [8, 1], strides = [1, 1]} : vector<8x4xf32> to vector<8x1xf32>
    %192 = vector.broadcast %191 : vector<8x1xf32> to vector<8x128xf32>
    %193 = arith.mulf %192, %18 : vector<8x128xf32>
    %194 = arith.addf %190, %193 : vector<8x128xf32>
    %cst_33 = arith.constant 0.000000e+00 : f32
    %195 = vector.broadcast %cst_33 : f32 to vector<8x128xf32>
    %196 = arith.maximumf %194, %195 : vector<8x128xf32>
    %197 = vector.broadcast %177 : vector<8x1xf32> to vector<8x128xf32>
    %198 = arith.mulf %196, %197 : vector<8x128xf32>
    %199 = arith.addf %169, %198 : vector<8x128xf32>
    %c6_i32 = arith.constant 6 : i32
    %c8_i32_34 = arith.constant 8 : i32
    %200 = arith.muli %c6_i32, %c8_i32_34 : i32
    %201 = tpu.assume_multiple %200, 8 : i32
    %202 = arith.index_cast %201 : i32 to index
    %c0_35 = arith.constant 0 : index
    %203 = vector.load %arg2[%202, %c0_35] : memref<128x4xf32, #tpu.memory_space<vmem>>, vector<8x4xf32>
    %204 = arith.index_cast %201 : i32 to index
    %c0_36 = arith.constant 0 : index
    %205 = vector.load %arg3[%204, %c0_36] : memref<128x1xf32, #tpu.memory_space<vmem>>, vector<8x1xf32>
    %206 = arith.index_cast %201 : i32 to index
    %c0_37 = arith.constant 0 : index
    %207 = vector.load %arg4[%206, %c0_37] : memref<128x1xf32, #tpu.memory_space<vmem>>, vector<8x1xf32>
    %208 = vector.extract_strided_slice %203 {offsets = [0, 0], sizes = [8, 1], strides = [1, 1]} : vector<8x4xf32> to vector<8x1xf32>
    %209 = vector.broadcast %208 : vector<8x1xf32> to vector<8x128xf32>
    %210 = arith.mulf %209, %9 : vector<8x128xf32>
    %211 = vector.broadcast %205 : vector<8x1xf32> to vector<8x128xf32>
    %212 = arith.addf %211, %210 : vector<8x128xf32>
    %213 = vector.extract_strided_slice %203 {offsets = [0, 1], sizes = [8, 1], strides = [1, 1]} : vector<8x4xf32> to vector<8x1xf32>
    %214 = vector.broadcast %213 : vector<8x1xf32> to vector<8x128xf32>
    %215 = arith.mulf %214, %12 : vector<8x128xf32>
    %216 = arith.addf %212, %215 : vector<8x128xf32>
    %217 = vector.extract_strided_slice %203 {offsets = [0, 2], sizes = [8, 1], strides = [1, 1]} : vector<8x4xf32> to vector<8x1xf32>
    %218 = vector.broadcast %217 : vector<8x1xf32> to vector<8x128xf32>
    %219 = arith.mulf %218, %15 : vector<8x128xf32>
    %220 = arith.addf %216, %219 : vector<8x128xf32>
    %221 = vector.extract_strided_slice %203 {offsets = [0, 3], sizes = [8, 1], strides = [1, 1]} : vector<8x4xf32> to vector<8x1xf32>
    %222 = vector.broadcast %221 : vector<8x1xf32> to vector<8x128xf32>
    %223 = arith.mulf %222, %18 : vector<8x128xf32>
    %224 = arith.addf %220, %223 : vector<8x128xf32>
    %cst_38 = arith.constant 0.000000e+00 : f32
    %225 = vector.broadcast %cst_38 : f32 to vector<8x128xf32>
    %226 = arith.maximumf %224, %225 : vector<8x128xf32>
    %227 = vector.broadcast %207 : vector<8x1xf32> to vector<8x128xf32>
    %228 = arith.mulf %226, %227 : vector<8x128xf32>
    %229 = arith.addf %199, %228 : vector<8x128xf32>
    %c7_i32 = arith.constant 7 : i32
    %c8_i32_39 = arith.constant 8 : i32
    %230 = arith.muli %c7_i32, %c8_i32_39 : i32
    %231 = tpu.assume_multiple %230, 8 : i32
    %232 = arith.index_cast %231 : i32 to index
    %c0_40 = arith.constant 0 : index
    %233 = vector.load %arg2[%232, %c0_40] : memref<128x4xf32, #tpu.memory_space<vmem>>, vector<8x4xf32>
    %234 = arith.index_cast %231 : i32 to index
    %c0_41 = arith.constant 0 : index
    %235 = vector.load %arg3[%234, %c0_41] : memref<128x1xf32, #tpu.memory_space<vmem>>, vector<8x1xf32>
    %236 = arith.index_cast %231 : i32 to index
    %c0_42 = arith.constant 0 : index
    %237 = vector.load %arg4[%236, %c0_42] : memref<128x1xf32, #tpu.memory_space<vmem>>, vector<8x1xf32>
    %238 = vector.extract_strided_slice %233 {offsets = [0, 0], sizes = [8, 1], strides = [1, 1]} : vector<8x4xf32> to vector<8x1xf32>
    %239 = vector.broadcast %238 : vector<8x1xf32> to vector<8x128xf32>
    %240 = arith.mulf %239, %9 : vector<8x128xf32>
    %241 = vector.broadcast %235 : vector<8x1xf32> to vector<8x128xf32>
    %242 = arith.addf %241, %240 : vector<8x128xf32>
    %243 = vector.extract_strided_slice %233 {offsets = [0, 1], sizes = [8, 1], strides = [1, 1]} : vector<8x4xf32> to vector<8x1xf32>
    %244 = vector.broadcast %243 : vector<8x1xf32> to vector<8x128xf32>
    %245 = arith.mulf %244, %12 : vector<8x128xf32>
    %246 = arith.addf %242, %245 : vector<8x128xf32>
    %247 = vector.extract_strided_slice %233 {offsets = [0, 2], sizes = [8, 1], strides = [1, 1]} : vector<8x4xf32> to vector<8x1xf32>
    %248 = vector.broadcast %247 : vector<8x1xf32> to vector<8x128xf32>
    %249 = arith.mulf %248, %15 : vector<8x128xf32>
    %250 = arith.addf %246, %249 : vector<8x128xf32>
    %251 = vector.extract_strided_slice %233 {offsets = [0, 3], sizes = [8, 1], strides = [1, 1]} : vector<8x4xf32> to vector<8x1xf32>
    %252 = vector.broadcast %251 : vector<8x1xf32> to vector<8x128xf32>
    %253 = arith.mulf %252, %18 : vector<8x128xf32>
    %254 = arith.addf %250, %253 : vector<8x128xf32>
    %cst_43 = arith.constant 0.000000e+00 : f32
    %255 = vector.broadcast %cst_43 : f32 to vector<8x128xf32>
    %256 = arith.maximumf %254, %255 : vector<8x128xf32>
    %257 = vector.broadcast %237 : vector<8x1xf32> to vector<8x128xf32>
    %258 = arith.mulf %256, %257 : vector<8x128xf32>
    %259 = arith.addf %229, %258 : vector<8x128xf32>
    %c8_i32_44 = arith.constant 8 : i32
    %c8_i32_45 = arith.constant 8 : i32
    %260 = arith.muli %c8_i32_44, %c8_i32_45 : i32
    %261 = tpu.assume_multiple %260, 8 : i32
    %262 = arith.index_cast %261 : i32 to index
    %c0_46 = arith.constant 0 : index
    %263 = vector.load %arg2[%262, %c0_46] : memref<128x4xf32, #tpu.memory_space<vmem>>, vector<8x4xf32>
    %264 = arith.index_cast %261 : i32 to index
    %c0_47 = arith.constant 0 : index
    %265 = vector.load %arg3[%264, %c0_47] : memref<128x1xf32, #tpu.memory_space<vmem>>, vector<8x1xf32>
    %266 = arith.index_cast %261 : i32 to index
    %c0_48 = arith.constant 0 : index
    %267 = vector.load %arg4[%266, %c0_48] : memref<128x1xf32, #tpu.memory_space<vmem>>, vector<8x1xf32>
    %268 = vector.extract_strided_slice %263 {offsets = [0, 0], sizes = [8, 1], strides = [1, 1]} : vector<8x4xf32> to vector<8x1xf32>
    %269 = vector.broadcast %268 : vector<8x1xf32> to vector<8x128xf32>
    %270 = arith.mulf %269, %9 : vector<8x128xf32>
    %271 = vector.broadcast %265 : vector<8x1xf32> to vector<8x128xf32>
    %272 = arith.addf %271, %270 : vector<8x128xf32>
    %273 = vector.extract_strided_slice %263 {offsets = [0, 1], sizes = [8, 1], strides = [1, 1]} : vector<8x4xf32> to vector<8x1xf32>
    %274 = vector.broadcast %273 : vector<8x1xf32> to vector<8x128xf32>
    %275 = arith.mulf %274, %12 : vector<8x128xf32>
    %276 = arith.addf %272, %275 : vector<8x128xf32>
    %277 = vector.extract_strided_slice %263 {offsets = [0, 2], sizes = [8, 1], strides = [1, 1]} : vector<8x4xf32> to vector<8x1xf32>
    %278 = vector.broadcast %277 : vector<8x1xf32> to vector<8x128xf32>
    %279 = arith.mulf %278, %15 : vector<8x128xf32>
    %280 = arith.addf %276, %279 : vector<8x128xf32>
    %281 = vector.extract_strided_slice %263 {offsets = [0, 3], sizes = [8, 1], strides = [1, 1]} : vector<8x4xf32> to vector<8x1xf32>
    %282 = vector.broadcast %281 : vector<8x1xf32> to vector<8x128xf32>
    %283 = arith.mulf %282, %18 : vector<8x128xf32>
    %284 = arith.addf %280, %283 : vector<8x128xf32>
    %cst_49 = arith.constant 0.000000e+00 : f32
    %285 = vector.broadcast %cst_49 : f32 to vector<8x128xf32>
    %286 = arith.maximumf %284, %285 : vector<8x128xf32>
    %287 = vector.broadcast %267 : vector<8x1xf32> to vector<8x128xf32>
    %288 = arith.mulf %286, %287 : vector<8x128xf32>
    %289 = arith.addf %259, %288 : vector<8x128xf32>
    %c9_i32 = arith.constant 9 : i32
    %c8_i32_50 = arith.constant 8 : i32
    %290 = arith.muli %c9_i32, %c8_i32_50 : i32
    %291 = tpu.assume_multiple %290, 8 : i32
    %292 = arith.index_cast %291 : i32 to index
    %c0_51 = arith.constant 0 : index
    %293 = vector.load %arg2[%292, %c0_51] : memref<128x4xf32, #tpu.memory_space<vmem>>, vector<8x4xf32>
    %294 = arith.index_cast %291 : i32 to index
    %c0_52 = arith.constant 0 : index
    %295 = vector.load %arg3[%294, %c0_52] : memref<128x1xf32, #tpu.memory_space<vmem>>, vector<8x1xf32>
    %296 = arith.index_cast %291 : i32 to index
    %c0_53 = arith.constant 0 : index
    %297 = vector.load %arg4[%296, %c0_53] : memref<128x1xf32, #tpu.memory_space<vmem>>, vector<8x1xf32>
    %298 = vector.extract_strided_slice %293 {offsets = [0, 0], sizes = [8, 1], strides = [1, 1]} : vector<8x4xf32> to vector<8x1xf32>
    %299 = vector.broadcast %298 : vector<8x1xf32> to vector<8x128xf32>
    %300 = arith.mulf %299, %9 : vector<8x128xf32>
    %301 = vector.broadcast %295 : vector<8x1xf32> to vector<8x128xf32>
    %302 = arith.addf %301, %300 : vector<8x128xf32>
    %303 = vector.extract_strided_slice %293 {offsets = [0, 1], sizes = [8, 1], strides = [1, 1]} : vector<8x4xf32> to vector<8x1xf32>
    %304 = vector.broadcast %303 : vector<8x1xf32> to vector<8x128xf32>
    %305 = arith.mulf %304, %12 : vector<8x128xf32>
    %306 = arith.addf %302, %305 : vector<8x128xf32>
    %307 = vector.extract_strided_slice %293 {offsets = [0, 2], sizes = [8, 1], strides = [1, 1]} : vector<8x4xf32> to vector<8x1xf32>
    %308 = vector.broadcast %307 : vector<8x1xf32> to vector<8x128xf32>
    %309 = arith.mulf %308, %15 : vector<8x128xf32>
    %310 = arith.addf %306, %309 : vector<8x128xf32>
    %311 = vector.extract_strided_slice %293 {offsets = [0, 3], sizes = [8, 1], strides = [1, 1]} : vector<8x4xf32> to vector<8x1xf32>
    %312 = vector.broadcast %311 : vector<8x1xf32> to vector<8x128xf32>
    %313 = arith.mulf %312, %18 : vector<8x128xf32>
    %314 = arith.addf %310, %313 : vector<8x128xf32>
    %cst_54 = arith.constant 0.000000e+00 : f32
    %315 = vector.broadcast %cst_54 : f32 to vector<8x128xf32>
    %316 = arith.maximumf %314, %315 : vector<8x128xf32>
    %317 = vector.broadcast %297 : vector<8x1xf32> to vector<8x128xf32>
    %318 = arith.mulf %316, %317 : vector<8x128xf32>
    %319 = arith.addf %289, %318 : vector<8x128xf32>
    %c10_i32 = arith.constant 10 : i32
    %c8_i32_55 = arith.constant 8 : i32
    %320 = arith.muli %c10_i32, %c8_i32_55 : i32
    %321 = tpu.assume_multiple %320, 8 : i32
    %322 = arith.index_cast %321 : i32 to index
    %c0_56 = arith.constant 0 : index
    %323 = vector.load %arg2[%322, %c0_56] : memref<128x4xf32, #tpu.memory_space<vmem>>, vector<8x4xf32>
    %324 = arith.index_cast %321 : i32 to index
    %c0_57 = arith.constant 0 : index
    %325 = vector.load %arg3[%324, %c0_57] : memref<128x1xf32, #tpu.memory_space<vmem>>, vector<8x1xf32>
    %326 = arith.index_cast %321 : i32 to index
    %c0_58 = arith.constant 0 : index
    %327 = vector.load %arg4[%326, %c0_58] : memref<128x1xf32, #tpu.memory_space<vmem>>, vector<8x1xf32>
    %328 = vector.extract_strided_slice %323 {offsets = [0, 0], sizes = [8, 1], strides = [1, 1]} : vector<8x4xf32> to vector<8x1xf32>
    %329 = vector.broadcast %328 : vector<8x1xf32> to vector<8x128xf32>
    %330 = arith.mulf %329, %9 : vector<8x128xf32>
    %331 = vector.broadcast %325 : vector<8x1xf32> to vector<8x128xf32>
    %332 = arith.addf %331, %330 : vector<8x128xf32>
    %333 = vector.extract_strided_slice %323 {offsets = [0, 1], sizes = [8, 1], strides = [1, 1]} : vector<8x4xf32> to vector<8x1xf32>
    %334 = vector.broadcast %333 : vector<8x1xf32> to vector<8x128xf32>
    %335 = arith.mulf %334, %12 : vector<8x128xf32>
    %336 = arith.addf %332, %335 : vector<8x128xf32>
    %337 = vector.extract_strided_slice %323 {offsets = [0, 2], sizes = [8, 1], strides = [1, 1]} : vector<8x4xf32> to vector<8x1xf32>
    %338 = vector.broadcast %337 : vector<8x1xf32> to vector<8x128xf32>
    %339 = arith.mulf %338, %15 : vector<8x128xf32>
    %340 = arith.addf %336, %339 : vector<8x128xf32>
    %341 = vector.extract_strided_slice %323 {offsets = [0, 3], sizes = [8, 1], strides = [1, 1]} : vector<8x4xf32> to vector<8x1xf32>
    %342 = vector.broadcast %341 : vector<8x1xf32> to vector<8x128xf32>
    %343 = arith.mulf %342, %18 : vector<8x128xf32>
    %344 = arith.addf %340, %343 : vector<8x128xf32>
    %cst_59 = arith.constant 0.000000e+00 : f32
    %345 = vector.broadcast %cst_59 : f32 to vector<8x128xf32>
    %346 = arith.maximumf %344, %345 : vector<8x128xf32>
    %347 = vector.broadcast %327 : vector<8x1xf32> to vector<8x128xf32>
    %348 = arith.mulf %346, %347 : vector<8x128xf32>
    %349 = arith.addf %319, %348 : vector<8x128xf32>
    %c11_i32 = arith.constant 11 : i32
    %c8_i32_60 = arith.constant 8 : i32
    %350 = arith.muli %c11_i32, %c8_i32_60 : i32
    %351 = tpu.assume_multiple %350, 8 : i32
    %352 = arith.index_cast %351 : i32 to index
    %c0_61 = arith.constant 0 : index
    %353 = vector.load %arg2[%352, %c0_61] : memref<128x4xf32, #tpu.memory_space<vmem>>, vector<8x4xf32>
    %354 = arith.index_cast %351 : i32 to index
    %c0_62 = arith.constant 0 : index
    %355 = vector.load %arg3[%354, %c0_62] : memref<128x1xf32, #tpu.memory_space<vmem>>, vector<8x1xf32>
    %356 = arith.index_cast %351 : i32 to index
    %c0_63 = arith.constant 0 : index
    %357 = vector.load %arg4[%356, %c0_63] : memref<128x1xf32, #tpu.memory_space<vmem>>, vector<8x1xf32>
    %358 = vector.extract_strided_slice %353 {offsets = [0, 0], sizes = [8, 1], strides = [1, 1]} : vector<8x4xf32> to vector<8x1xf32>
    %359 = vector.broadcast %358 : vector<8x1xf32> to vector<8x128xf32>
    %360 = arith.mulf %359, %9 : vector<8x128xf32>
    %361 = vector.broadcast %355 : vector<8x1xf32> to vector<8x128xf32>
    %362 = arith.addf %361, %360 : vector<8x128xf32>
    %363 = vector.extract_strided_slice %353 {offsets = [0, 1], sizes = [8, 1], strides = [1, 1]} : vector<8x4xf32> to vector<8x1xf32>
    %364 = vector.broadcast %363 : vector<8x1xf32> to vector<8x128xf32>
    %365 = arith.mulf %364, %12 : vector<8x128xf32>
    %366 = arith.addf %362, %365 : vector<8x128xf32>
    %367 = vector.extract_strided_slice %353 {offsets = [0, 2], sizes = [8, 1], strides = [1, 1]} : vector<8x4xf32> to vector<8x1xf32>
    %368 = vector.broadcast %367 : vector<8x1xf32> to vector<8x128xf32>
    %369 = arith.mulf %368, %15 : vector<8x128xf32>
    %370 = arith.addf %366, %369 : vector<8x128xf32>
    %371 = vector.extract_strided_slice %353 {offsets = [0, 3], sizes = [8, 1], strides = [1, 1]} : vector<8x4xf32> to vector<8x1xf32>
    %372 = vector.broadcast %371 : vector<8x1xf32> to vector<8x128xf32>
    %373 = arith.mulf %372, %18 : vector<8x128xf32>
    %374 = arith.addf %370, %373 : vector<8x128xf32>
    %cst_64 = arith.constant 0.000000e+00 : f32
    %375 = vector.broadcast %cst_64 : f32 to vector<8x128xf32>
    %376 = arith.maximumf %374, %375 : vector<8x128xf32>
    %377 = vector.broadcast %357 : vector<8x1xf32> to vector<8x128xf32>
    %378 = arith.mulf %376, %377 : vector<8x128xf32>
    %379 = arith.addf %349, %378 : vector<8x128xf32>
    %c12_i32 = arith.constant 12 : i32
    %c8_i32_65 = arith.constant 8 : i32
    %380 = arith.muli %c12_i32, %c8_i32_65 : i32
    %381 = tpu.assume_multiple %380, 8 : i32
    %382 = arith.index_cast %381 : i32 to index
    %c0_66 = arith.constant 0 : index
    %383 = vector.load %arg2[%382, %c0_66] : memref<128x4xf32, #tpu.memory_space<vmem>>, vector<8x4xf32>
    %384 = arith.index_cast %381 : i32 to index
    %c0_67 = arith.constant 0 : index
    %385 = vector.load %arg3[%384, %c0_67] : memref<128x1xf32, #tpu.memory_space<vmem>>, vector<8x1xf32>
    %386 = arith.index_cast %381 : i32 to index
    %c0_68 = arith.constant 0 : index
    %387 = vector.load %arg4[%386, %c0_68] : memref<128x1xf32, #tpu.memory_space<vmem>>, vector<8x1xf32>
    %388 = vector.extract_strided_slice %383 {offsets = [0, 0], sizes = [8, 1], strides = [1, 1]} : vector<8x4xf32> to vector<8x1xf32>
    %389 = vector.broadcast %388 : vector<8x1xf32> to vector<8x128xf32>
    %390 = arith.mulf %389, %9 : vector<8x128xf32>
    %391 = vector.broadcast %385 : vector<8x1xf32> to vector<8x128xf32>
    %392 = arith.addf %391, %390 : vector<8x128xf32>
    %393 = vector.extract_strided_slice %383 {offsets = [0, 1], sizes = [8, 1], strides = [1, 1]} : vector<8x4xf32> to vector<8x1xf32>
    %394 = vector.broadcast %393 : vector<8x1xf32> to vector<8x128xf32>
    %395 = arith.mulf %394, %12 : vector<8x128xf32>
    %396 = arith.addf %392, %395 : vector<8x128xf32>
    %397 = vector.extract_strided_slice %383 {offsets = [0, 2], sizes = [8, 1], strides = [1, 1]} : vector<8x4xf32> to vector<8x1xf32>
    %398 = vector.broadcast %397 : vector<8x1xf32> to vector<8x128xf32>
    %399 = arith.mulf %398, %15 : vector<8x128xf32>
    %400 = arith.addf %396, %399 : vector<8x128xf32>
    %401 = vector.extract_strided_slice %383 {offsets = [0, 3], sizes = [8, 1], strides = [1, 1]} : vector<8x4xf32> to vector<8x1xf32>
    %402 = vector.broadcast %401 : vector<8x1xf32> to vector<8x128xf32>
    %403 = arith.mulf %402, %18 : vector<8x128xf32>
    %404 = arith.addf %400, %403 : vector<8x128xf32>
    %cst_69 = arith.constant 0.000000e+00 : f32
    %405 = vector.broadcast %cst_69 : f32 to vector<8x128xf32>
    %406 = arith.maximumf %404, %405 : vector<8x128xf32>
    %407 = vector.broadcast %387 : vector<8x1xf32> to vector<8x128xf32>
    %408 = arith.mulf %406, %407 : vector<8x128xf32>
    %409 = arith.addf %379, %408 : vector<8x128xf32>
    %c13_i32 = arith.constant 13 : i32
    %c8_i32_70 = arith.constant 8 : i32
    %410 = arith.muli %c13_i32, %c8_i32_70 : i32
    %411 = tpu.assume_multiple %410, 8 : i32
    %412 = arith.index_cast %411 : i32 to index
    %c0_71 = arith.constant 0 : index
    %413 = vector.load %arg2[%412, %c0_71] : memref<128x4xf32, #tpu.memory_space<vmem>>, vector<8x4xf32>
    %414 = arith.index_cast %411 : i32 to index
    %c0_72 = arith.constant 0 : index
    %415 = vector.load %arg3[%414, %c0_72] : memref<128x1xf32, #tpu.memory_space<vmem>>, vector<8x1xf32>
    %416 = arith.index_cast %411 : i32 to index
    %c0_73 = arith.constant 0 : index
    %417 = vector.load %arg4[%416, %c0_73] : memref<128x1xf32, #tpu.memory_space<vmem>>, vector<8x1xf32>
    %418 = vector.extract_strided_slice %413 {offsets = [0, 0], sizes = [8, 1], strides = [1, 1]} : vector<8x4xf32> to vector<8x1xf32>
    %419 = vector.broadcast %418 : vector<8x1xf32> to vector<8x128xf32>
    %420 = arith.mulf %419, %9 : vector<8x128xf32>
    %421 = vector.broadcast %415 : vector<8x1xf32> to vector<8x128xf32>
    %422 = arith.addf %421, %420 : vector<8x128xf32>
    %423 = vector.extract_strided_slice %413 {offsets = [0, 1], sizes = [8, 1], strides = [1, 1]} : vector<8x4xf32> to vector<8x1xf32>
    %424 = vector.broadcast %423 : vector<8x1xf32> to vector<8x128xf32>
    %425 = arith.mulf %424, %12 : vector<8x128xf32>
    %426 = arith.addf %422, %425 : vector<8x128xf32>
    %427 = vector.extract_strided_slice %413 {offsets = [0, 2], sizes = [8, 1], strides = [1, 1]} : vector<8x4xf32> to vector<8x1xf32>
    %428 = vector.broadcast %427 : vector<8x1xf32> to vector<8x128xf32>
    %429 = arith.mulf %428, %15 : vector<8x128xf32>
    %430 = arith.addf %426, %429 : vector<8x128xf32>
    %431 = vector.extract_strided_slice %413 {offsets = [0, 3], sizes = [8, 1], strides = [1, 1]} : vector<8x4xf32> to vector<8x1xf32>
    %432 = vector.broadcast %431 : vector<8x1xf32> to vector<8x128xf32>
    %433 = arith.mulf %432, %18 : vector<8x128xf32>
    %434 = arith.addf %430, %433 : vector<8x128xf32>
    %cst_74 = arith.constant 0.000000e+00 : f32
    %435 = vector.broadcast %cst_74 : f32 to vector<8x128xf32>
    %436 = arith.maximumf %434, %435 : vector<8x128xf32>
    %437 = vector.broadcast %417 : vector<8x1xf32> to vector<8x128xf32>
    %438 = arith.mulf %436, %437 : vector<8x128xf32>
    %439 = arith.addf %409, %438 : vector<8x128xf32>
    %c14_i32 = arith.constant 14 : i32
    %c8_i32_75 = arith.constant 8 : i32
    %440 = arith.muli %c14_i32, %c8_i32_75 : i32
    %441 = tpu.assume_multiple %440, 8 : i32
    %442 = arith.index_cast %441 : i32 to index
    %c0_76 = arith.constant 0 : index
    %443 = vector.load %arg2[%442, %c0_76] : memref<128x4xf32, #tpu.memory_space<vmem>>, vector<8x4xf32>
    %444 = arith.index_cast %441 : i32 to index
    %c0_77 = arith.constant 0 : index
    %445 = vector.load %arg3[%444, %c0_77] : memref<128x1xf32, #tpu.memory_space<vmem>>, vector<8x1xf32>
    %446 = arith.index_cast %441 : i32 to index
    %c0_78 = arith.constant 0 : index
    %447 = vector.load %arg4[%446, %c0_78] : memref<128x1xf32, #tpu.memory_space<vmem>>, vector<8x1xf32>
    %448 = vector.extract_strided_slice %443 {offsets = [0, 0], sizes = [8, 1], strides = [1, 1]} : vector<8x4xf32> to vector<8x1xf32>
    %449 = vector.broadcast %448 : vector<8x1xf32> to vector<8x128xf32>
    %450 = arith.mulf %449, %9 : vector<8x128xf32>
    %451 = vector.broadcast %445 : vector<8x1xf32> to vector<8x128xf32>
    %452 = arith.addf %451, %450 : vector<8x128xf32>
    %453 = vector.extract_strided_slice %443 {offsets = [0, 1], sizes = [8, 1], strides = [1, 1]} : vector<8x4xf32> to vector<8x1xf32>
    %454 = vector.broadcast %453 : vector<8x1xf32> to vector<8x128xf32>
    %455 = arith.mulf %454, %12 : vector<8x128xf32>
    %456 = arith.addf %452, %455 : vector<8x128xf32>
    %457 = vector.extract_strided_slice %443 {offsets = [0, 2], sizes = [8, 1], strides = [1, 1]} : vector<8x4xf32> to vector<8x1xf32>
    %458 = vector.broadcast %457 : vector<8x1xf32> to vector<8x128xf32>
    %459 = arith.mulf %458, %15 : vector<8x128xf32>
    %460 = arith.addf %456, %459 : vector<8x128xf32>
    %461 = vector.extract_strided_slice %443 {offsets = [0, 3], sizes = [8, 1], strides = [1, 1]} : vector<8x4xf32> to vector<8x1xf32>
    %462 = vector.broadcast %461 : vector<8x1xf32> to vector<8x128xf32>
    %463 = arith.mulf %462, %18 : vector<8x128xf32>
    %464 = arith.addf %460, %463 : vector<8x128xf32>
    %cst_79 = arith.constant 0.000000e+00 : f32
    %465 = vector.broadcast %cst_79 : f32 to vector<8x128xf32>
    %466 = arith.maximumf %464, %465 : vector<8x128xf32>
    %467 = vector.broadcast %447 : vector<8x1xf32> to vector<8x128xf32>
    %468 = arith.mulf %466, %467 : vector<8x128xf32>
    %469 = arith.addf %439, %468 : vector<8x128xf32>
    %c15_i32 = arith.constant 15 : i32
    %c8_i32_80 = arith.constant 8 : i32
    %470 = arith.muli %c15_i32, %c8_i32_80 : i32
    %471 = tpu.assume_multiple %470, 8 : i32
    %472 = arith.index_cast %471 : i32 to index
    %c0_81 = arith.constant 0 : index
    %473 = vector.load %arg2[%472, %c0_81] : memref<128x4xf32, #tpu.memory_space<vmem>>, vector<8x4xf32>
    %474 = arith.index_cast %471 : i32 to index
    %c0_82 = arith.constant 0 : index
    %475 = vector.load %arg3[%474, %c0_82] : memref<128x1xf32, #tpu.memory_space<vmem>>, vector<8x1xf32>
    %476 = arith.index_cast %471 : i32 to index
    %c0_83 = arith.constant 0 : index
    %477 = vector.load %arg4[%476, %c0_83] : memref<128x1xf32, #tpu.memory_space<vmem>>, vector<8x1xf32>
    %478 = vector.extract_strided_slice %473 {offsets = [0, 0], sizes = [8, 1], strides = [1, 1]} : vector<8x4xf32> to vector<8x1xf32>
    %479 = vector.broadcast %478 : vector<8x1xf32> to vector<8x128xf32>
    %480 = arith.mulf %479, %9 : vector<8x128xf32>
    %481 = vector.broadcast %475 : vector<8x1xf32> to vector<8x128xf32>
    %482 = arith.addf %481, %480 : vector<8x128xf32>
    %483 = vector.extract_strided_slice %473 {offsets = [0, 1], sizes = [8, 1], strides = [1, 1]} : vector<8x4xf32> to vector<8x1xf32>
    %484 = vector.broadcast %483 : vector<8x1xf32> to vector<8x128xf32>
    %485 = arith.mulf %484, %12 : vector<8x128xf32>
    %486 = arith.addf %482, %485 : vector<8x128xf32>
    %487 = vector.extract_strided_slice %473 {offsets = [0, 2], sizes = [8, 1], strides = [1, 1]} : vector<8x4xf32> to vector<8x1xf32>
    %488 = vector.broadcast %487 : vector<8x1xf32> to vector<8x128xf32>
    %489 = arith.mulf %488, %15 : vector<8x128xf32>
    %490 = arith.addf %486, %489 : vector<8x128xf32>
    %491 = vector.extract_strided_slice %473 {offsets = [0, 3], sizes = [8, 1], strides = [1, 1]} : vector<8x4xf32> to vector<8x1xf32>
    %492 = vector.broadcast %491 : vector<8x1xf32> to vector<8x128xf32>
    %493 = arith.mulf %492, %18 : vector<8x128xf32>
    %494 = arith.addf %490, %493 : vector<8x128xf32>
    %cst_84 = arith.constant 0.000000e+00 : f32
    %495 = vector.broadcast %cst_84 : f32 to vector<8x128xf32>
    %496 = arith.maximumf %494, %495 : vector<8x128xf32>
    %497 = vector.broadcast %477 : vector<8x1xf32> to vector<8x128xf32>
    %498 = arith.mulf %496, %497 : vector<8x128xf32>
    %499 = arith.addf %469, %498 : vector<8x128xf32>
    %c16_i32 = arith.constant 16 : i32
    %cst_85 = arith.constant dense<0.000000e+00> : vector<128xf32>
    %500 = vector.multi_reduction <add>, %499, %cst_85 [0] : vector<8x128xf32> to vector<128xf32>
    %501 = vector.shape_cast %500 : vector<128xf32> to vector<1x128xf32>
    %502 = vector.broadcast %0 : f32 to vector<1x128xf32>
    %503 = arith.addf %501, %502 : vector<1x128xf32>
    %c0_86 = arith.constant 0 : index
    %504 = arith.index_cast %4 : i32 to index
    %505 = vector.load %arg6[%c0_86, %504] : memref<1x128xf32, #tpu.memory_space<vmem>>, vector<1x128xf32>
    tpu.vector_store %arg6[%c0_86, %504], %503 {strides = array<i32>} : memref<1x128xf32, #tpu.memory_space<vmem>>, vector<1x128xf32>,
    %c1_i32_87 = arith.constant 1 : i32
    return
  }
  func.func @transform_0(%arg0: i32) -> (i32, i32) {
    %c0_i32 = arith.constant 0 : i32
    %c0_i32_0 = arith.constant 0 : i32
    return %c0_i32, %arg0 : i32, i32
  }
  func.func @transform_1(%arg0: i32) -> (i32, i32) {
    %c0_i32 = arith.constant 0 : i32
    %c0_i32_0 = arith.constant 0 : i32
    %c0_i32_1 = arith.constant 0 : i32
    return %c0_i32, %c0_i32_0 : i32, i32
  }
  func.func @transform_2(%arg0: i32) -> (i32, i32) {
    %c0_i32 = arith.constant 0 : i32
    %c0_i32_0 = arith.constant 0 : i32
    %c0_i32_1 = arith.constant 0 : i32
    return %c0_i32, %c0_i32_0 : i32, i32
  }
  func.func @transform_3(%arg0: i32) -> (i32, i32) {
    %c0_i32 = arith.constant 0 : i32
    %c0_i32_0 = arith.constant 0 : i32
    %c0_i32_1 = arith.constant 0 : i32
    return %c0_i32, %c0_i32_0 : i32, i32
  }
  func.func @transform_4(%arg0: i32) -> (i32, i32) {
    %c0_i32 = arith.constant 0 : i32
    %c0_i32_0 = arith.constant 0 : i32
    %c0_i32_1 = arith.constant 0 : i32
    return %c0_i32, %c0_i32_0 : i32, i32
  }
  func.func @transform_5(%arg0: i32) -> (i32, i32) {
    %c0_i32 = arith.constant 0 : i32
    %c0_i32_0 = arith.constant 0 : i32
    return %c0_i32, %arg0 : i32, i32
  }
}

</mosaic_0001>

<bundles_post_ra>
// kernel: tpu_custom_call.1
= control target key start
LH: loop header
LB: loop body
LE: loop exit
PB: predicated region body
PF: predicated region fallthrough
CT: control target
= control target key end

     0   :  { %v888_v1 = vmov 3   ;;  %v889_v2 = vmov 1   ;;  %v890_v4 = vmov 2   ;;  %s1338_s0 = inlined_call_operand.vmem [shape: f32[4,128], index: 0, kind: input, shape index: {}]   ;;  %s1339_s1 = inlined_call_operand.vmem [shape: f32[128,4], index: 1, kind: input, shape index: {}]   ;;  %s1340_s2 = inlined_call_operand.vmem [shape: f32[128,1], index: 2, kind: input, shape index: {}]   ;;  %s1341_s3 = inlined_call_operand.vmem [shape: f32[128,1], index: 3, kind: input, shape index: {}]   ;;  %s1342_s4 = inlined_call_operand.<no memory space> [shape: f32[1,1], index: 4, kind: input, shape index: {}]   ;;  %s1343_s5 = inlined_call_operand.hbm [shape: f32[1,128], index: 5, kind: output, shape index: {}]  }
   0x1   :  { %v926_v0 = vld [vmem:[%s1339_s1] sm:$0xff]  ;;  %816 = vset.pattern.permute.xlu0 %v888_v1  ;;  %814 = vset.pattern.permute.xlu1 %v889_v2  ;;  %v764_v3 = vld [vmem:[%s1339_s1 + $0x8] sm:$0xff]  ;;  %v767_v5 = vld [vmem:[%s1339_s1 + $0x10] sm:$0xff] }
   0x2   :  { %68 = vperm.xlu0 %816, %v926_v0   ;;  %56 = vperm.xlu1 %814, %v926_v0   ;;  %v42_v6 = vld [vmem:[%s1341_s3] sm:$0xff] }
   0x6   :  { %112 = vperm.xlu0 %816, %v764_v3   ;;  %815 = vset.pattern.permute.xlu1 %v890_v4 }
   0x7   :  { %62 = vperm.xlu1 %815, %v926_v0  }
   0xa   :  { %156 = vperm.xlu0 %816, %v767_v5  }
   0xb   :  { %11 = vsyncpa [#allocation4], 0  ;;  %v891_v7 = vmov 0   ;;  %v770_v8 = vld [vmem:[%s1339_s1 + $0x18] sm:$0xff]  ;;  %v773_v9 = vld [vmem:[%s1339_s1 + $0x20] sm:$0xff]  ;;  %s892_s14 = smov [#allocation3]  }
   0xc   :  { %817 = vset.pattern.permute.xlu1 %v891_v7  ;;  %v953_v10 = vld [vmem:[%s1339_s1 + $0x28] sm:$0xff]  ;;  %v960_v11 = vld [vmem:[%s1339_s1 + $0x30] sm:$0xff]  ;;  %v967_v12 = vld [vmem:[%s1339_s1 + $0x38] sm:$0xff]  ;;  %s756_s15 = sshll.u32 %s892_s14, 4  ;;  %s757_s15 = int_to_ptr.vmem [resolvable:$true] %s756_s15 }
   0xd   :  { %76 = vperm.xlu1 %817, %v42_v6   ;;  %v766_v13 = vld [vmem:[%s1341_s3 + $0x8] sm:$0xff]  ;;  %v977_v14 = vld [vmem:[%s1339_s1 + $0x40] sm:$0xff]  ;;  %v990_v16 = vld [vmem:[%s1339_s1 + $0x50] sm:$0xff]  ;;  %s866_s16 = scalar_lea.vmem %s757_s15, 16  ;;  %s870_s17 = scalar_lea.vmem %s757_s15, 32 }
   0xe   :  { %200 = vperm.xlu0 %816, %v770_v8   ;;  %v983_v15 = vld [vmem:[%s1339_s1 + $0x48] sm:$0xff]  ;;  %v996_v17 = vld [vmem:[%s1339_s1 + $0x58] sm:$0xff]  ;;  %v1003_v18 = vld [vmem:[%s1339_s1 + $0x60] sm:$0xff]  ;;  %p867_p0 = scmp.ne.s32.totalorder %s757_s15, %s866_s16  ;;  %p871_p1 = scmp.lt.s32.totalorder %s757_s15, %s757_s15 }
   0xf   :  { %v769_v19 = vld [vmem:[%s1341_s3 + $0x10] sm:$0xff]  ;;  %v772_v21 = vld [vmem:[%s1341_s3 + $0x18] sm:$0xff]  ;;  %v41_v22 = vld [vmem:[%s1340_s2] sm:$0xff]  ;;  %p872_p2 = scmp.lt.s32.totalorder %s870_s17, %s866_s16 }
  0x10   :  { %v1015_v20 = vld [vmem:[%s1339_s1 + $0x70] sm:$0xff]  ;;  %v765_v23 = vld [vmem:[%s1340_s2 + $0x8] sm:$0xff]  ;;  %v771_v25 = vld [vmem:[%s1340_s2 + $0x18] sm:$0xff] }
  0x11   :  { %89 = vperm.xlu1 %817, %v764_v3   ;;  %v768_v24 = vld [vmem:[%s1340_s2 + $0x10] sm:$0xff]  ;;  %v775_v26 = vld [vmem:[%s1341_s3 + $0x20] sm:$0xff]  ;;  %v777_v28 = vld [vmem:[%s1340_s2 + $0x28] sm:$0xff]  ;;  %p873_p3 = por %p872_p2, %p871_p1 }
  0x12   :  { %244 = vperm.xlu0 %816, %v773_v9   ;;  %v774_v27 = vld [vmem:[%s1340_s2 + $0x20] sm:$0xff]  ;;  %v780_v29 = vld [vmem:[%s1340_s2 + $0x30] sm:$0xff]  ;;  %v783_v30 = vld [vmem:[%s1340_s2 + $0x38] sm:$0xff] }
  0x13   :  { %v786_v31 = vld [vmem:[%s1340_s2 + $0x40] sm:$0xff]  ;;  %v778_v32 = vld [vmem:[%s1341_s3 + $0x28] sm:$0xff]  ;;  %v792_v34 = vld [vmem:[%s1340_s2 + $0x50] sm:$0xff]  ;;  %p874_p4 = pnand %p873_p3, %p867_p0 }
  0x14   :  { %v789_v33 = vld [vmem:[%s1340_s2 + $0x48] sm:$0xff]  ;;  %v795_v35 = vld [vmem:[%s1340_s2 + $0x58] sm:$0xff]  ;;  %v781_v38 = vld [vmem:[%s1341_s3 + $0x30] sm:$0xff] }
  0x15   :  { %818 = vset.pattern.permute.xlu1 %v889_v2  ;;  %v801_v36 = vld [vmem:[%s1340_s2 + $0x68] sm:$0xff]  ;;  %v796_v37 = vld [vmem:[%s1341_s3 + $0x58] sm:$0xff]  ;;  %v799_v41 = vld [vmem:[%s1341_s3 + $0x60] sm:$0xff] }
  0x16   :  { %100 = vperm.xlu1 %818, %v764_v3   ;;  %288 = vperm.xlu0 %816, %v953_v10   ;;  %v802_v44 = vld [vmem:[%s1341_s3 + $0x68] sm:$0xff]  ;;  %v808_v46 = vld [vmem:[%s1341_s3 + $0x78] sm:$0xff]  ;;  %v787_v61 = vld [vmem:[%s1341_s3 + $0x40] sm:$0xff] }
  0x17   :  { %v784_v51 = vld [vmem:[%s1341_s3 + $0x38] sm:$0xff] }
  0x1a   :  { %819 = vset.pattern.permute.xlu1 %v890_v4  ;;  %332 = vperm.xlu0 %816, %v960_v11  }
  0x1b   :  { %106 = vperm.xlu1 %819, %v764_v3  }
  0x1e   :  { %376 = vperm.xlu0 %816, %v967_v12  }
  0x1f   :  { %820 = vset.pattern.permute.xlu1 %v891_v7 }
  0x20   :  { %120 = vperm.xlu1 %820, %v766_v13  }
  0x22   :  { %420 = vperm.xlu0 %816, %v977_v14  }
  0x24   :  { %133 = vperm.xlu1 %820, %v767_v5  }
  0x26   :  { %464 = vperm.xlu0 %816, %v983_v15  }
  0x28   :  { %821 = vset.pattern.permute.xlu1 %v889_v2 }
  0x29   :  { %144 = vperm.xlu1 %821, %v767_v5  }
  0x2a   :  { %508 = vperm.xlu0 %816, %v990_v16  }
  0x2d   :  { %822 = vset.pattern.permute.xlu1 %v890_v4 }
  0x2e   :  { %150 = vperm.xlu1 %822, %v767_v5   ;;  %552 = vperm.xlu0 %816, %v996_v17  }
  0x32   :  { %823 = vset.pattern.permute.xlu1 %v891_v7  ;;  %596 = vperm.xlu0 %816, %v1003_v18  }
  0x33   :  { %164 = vperm.xlu1 %823, %v769_v19  }
  0x36   :  { %854 = vset.pattern.permute.xlu0 %v889_v2 }
  0x37   :  { %177 = vperm.xlu1 %823, %v770_v8   ;;  %584 = vperm.xlu0 %854, %v1003_v18  }
  0x3b   :  { %824 = vset.pattern.permute.xlu1 %v889_v2  ;;  %672 = vperm.xlu0 %854, %v1015_v20  }
  0x3c   :  { %188 = vperm.xlu1 %824, %v770_v8  }
  0x3f   :  { %858 = vset.pattern.permute.xlu0 %v890_v4 }
  0x40   :  { %825 = vset.pattern.permute.xlu1 %v890_v4  ;;  %678 = vperm.xlu0 %858, %v1015_v20  }
  0x41   :  { %194 = vperm.xlu1 %825, %v770_v8  }
  0x44   :  { %859 = vset.pattern.permute.xlu0 %v891_v7 }
  0x45   :  { %826 = vset.pattern.permute.xlu1 %v891_v7  ;;  %45 = vperm.xlu0 %859, %v926_v0  }
  0x46   :  { %208 = vperm.xlu1 %826, %v772_v21  }
  0x49   :  { %51 = vperm.xlu0 %859, %v41_v22  }
  0x4a   :  { %221 = vperm.xlu1 %826, %v773_v9  }
  0x4d   :  { %95 = vperm.xlu0 %859, %v765_v23   ;;  %v23_v23 = vld [vmem:[%s1338_s0] sm:$0xf] }
  0x4e   :  { %827 = vset.pattern.permute.xlu1 %v889_v2 }
  0x4f   :  { %232 = vperm.xlu1 %827, %v773_v9  }
  0x51   :  { %139 = vperm.xlu0 %859, %v768_v24  }
  0x53   :  { %828 = vset.pattern.permute.xlu1 %v890_v4 }
  0x54   :  { %238 = vperm.xlu1 %828, %v773_v9  }
  0x55   :  { %183 = vperm.xlu0 %859, %v771_v25  }
  0x58   :  { %829 = vset.pattern.permute.xlu1 %v891_v7 }
  0x59   :  { %252 = vperm.xlu1 %829, %v775_v26   ;;  %227 = vperm.xlu0 %859, %v774_v27  }
  0x5d   :  { %265 = vperm.xlu1 %829, %v953_v10   ;;  %271 = vperm.xlu0 %859, %v777_v28  }
  0x61   :  { %830 = vset.pattern.permute.xlu1 %v889_v2  ;;  %315 = vperm.xlu0 %859, %v780_v29  }
  0x62   :  { %276 = vperm.xlu1 %830, %v953_v10  }
  0x65   :  { %359 = vperm.xlu0 %859, %v783_v30  }
  0x66   :  { %831 = vset.pattern.permute.xlu1 %v890_v4 }
  0x67   :  { %282 = vperm.xlu1 %831, %v953_v10   ;;  %v790_v10 = vld [vmem:[%s1341_s3 + $0x48] sm:$0xff] }
  0x69   :  { %403 = vperm.xlu0 %859, %v786_v31  }
  0x6b   :  { %832 = vset.pattern.permute.xlu1 %v891_v7 }
  0x6c   :  { %296 = vperm.xlu1 %832, %v778_v32  }
  0x6d   :  { %447 = vperm.xlu0 %859, %v789_v33  }
  0x70   :  { %309 = vperm.xlu1 %832, %v960_v11  }
  0x71   :  { %491 = vperm.xlu0 %859, %v792_v34  }
  0x74   :  { %833 = vset.pattern.permute.xlu1 %v889_v2 }
  0x75   :  { %320 = vperm.xlu1 %833, %v960_v11   ;;  %535 = vperm.xlu0 %859, %v795_v35  }
  0x79   :  { %834 = vset.pattern.permute.xlu1 %v890_v4  ;;  %623 = vperm.xlu0 %859, %v801_v36  }
  0x7a   :  { %326 = vperm.xlu1 %834, %v960_v11   ;;  %v24_v11 = vlaneseq }
  0x7d   :  { %v1094_v39 = vpop.permute.xlu1 %56  ;;  %v1096_v40 = vpop.permute.xlu0 %68  ;;  %560 = vperm.xlu0 %859, %v796_v37  }
  0x7e   :  { %835 = vset.pattern.permute.xlu1 %v891_v7 }
  0x7f   :  { %340 = vperm.xlu1 %835, %v781_v38  }
  0x81   :  { %v1101_v42 = vpop.permute.xlu0 %112  ;;  %604 = vperm.xlu0 %859, %v799_v41  }
  0x82   :  { %v1104_v43 = vpop.permute.xlu1 %62 }
  0x83   :  { %353 = vperm.xlu1 %835, %v967_v12  }
  0x85   :  { %v1109_v45 = vpop.permute.xlu0 %156  ;;  %648 = vperm.xlu0 %859, %v802_v44  }
  0x87   :  { %836 = vset.pattern.permute.xlu1 %v889_v2 }
  0x88   :  { %364 = vperm.xlu1 %836, %v967_v12   ;;  %v1116_v47 = vpop.permute.xlu1 %76 }
  0x89   :  { %v1118_v48 = vpop.permute.xlu0 %200  ;;  %736 = vperm.xlu0 %859, %v808_v46   ;;  %v793_v46 = vld [vmem:[%s1341_s3 + $0x50] sm:$0xff] }
  0x8c   :  { %837 = vset.pattern.permute.xlu1 %v890_v4  ;;  %v1121_v49 = vpop.permute.xlu1 %89 }
  0x8d   :  { %370 = vperm.xlu1 %837, %v967_v12   ;;  %v1124_v50 = vpop.permute.xlu0 %244 }
  0x91   :  { %838 = vset.pattern.permute.xlu1 %v891_v7  ;;  %v1130_v52 = vpop.permute.xlu1 %100  ;;  %v1132_v53 = vpop.permute.xlu0 %288 }
  0x92   :  { %384 = vperm.xlu1 %838, %v784_v51  }
  0x95   :  { %v1137_v55 = vpop.permute.xlu0 %332 }
  0x96   :  { %397 = vperm.xlu1 %838, %v977_v14   ;;  %v1135_v54 = vpop.permute.xlu1 %106 }
  0x99   :  { %v1140_v56 = vpop.permute.xlu0 %376 }
  0x9a   :  { %839 = vset.pattern.permute.xlu1 %v889_v2 }
  0x9b   :  { %408 = vperm.xlu1 %839, %v977_v14   ;;  %v1143_v57 = vpop.permute.xlu1 %120 }
  0x9d   :  { %v1145_v58 = vpop.permute.xlu0 %420 }
  0x9f   :  { %840 = vset.pattern.permute.xlu1 %v890_v4  ;;  %v1148_v59 = vpop.permute.xlu1 %133 }
  0xa0   :  { %414 = vperm.xlu1 %840, %v977_v14   ;;  %v25_v14 = vshrl.u32 %v24_v11, 7 }
  0xa1   :  { %v1151_v60 = vpop.permute.xlu0 %464 }
  0xa2   :  { %v26_v19 = vsub.s32 0, %v25_v14  ;;  %v38_v24 = vsub.s32 3, %v25_v14  ;;  %v34_v25 = vsub.s32 2, %v25_v14 }
  0xa4   :  { %841 = vset.pattern.permute.xlu1 %v891_v7  ;;  %v145_v62 = vpop.permute.xlu1 %144  ;;  %v1184_v26 = vrot.slane %v23_v23, %v26_v19  ;;  %v1193_v31 = vrot.slane %v23_v23, %v38_v24  ;;  %v1195_v32 = vrot.slane %v23_v23, %v34_v25 }
  0xa5   :  { %428 = vperm.xlu1 %841, %v787_v61   ;;  %v1157_v63 = vpop.permute.xlu0 %508 }
  0xa6   :  { %v71_v37 = vmul.f32 %v1096_v40, %v1193_v31  ;;  %v65_v38 = vmul.f32 %v1104_v43, %v1195_v32  ;;  %v92_v41 = vmul.f32 %v1121_v49, %v1184_v26  ;;  %v115_v43 = vmul.f32 %v1101_v42, %v1193_v31 }
  0xa7   :  { %v109_v49 = vmul.f32 %v1135_v54, %v1195_v32  ;;  %v159_v24 = vmul.f32 %v1109_v45, %v1193_v31 }
  0xa9   :  { %441 = vperm.xlu1 %841, %v983_v15   ;;  %v151_v0 = vpop.permute.xlu1 %150  ;;  %v1160_v3 = vpop.permute.xlu0 %552 }
  0xaa   :  { %v153_v25 = vmul.f32 %v151_v0, %v1195_v32 }
  0xad   :  { %842 = vset.pattern.permute.xlu1 %v889_v2  ;;  %v1166_v6 = vpop.permute.xlu0 %596 }
  0xae   :  { %452 = vperm.xlu1 %842, %v983_v15   ;;  %v1164_v5 = vpop.permute.xlu1 %164 }
  0xb2   :  { %843 = vset.pattern.permute.xlu1 %v890_v4  ;;  %v178_v8 = vpop.permute.xlu1 %177  ;;  %v1170_v9 = vpop.permute.xlu0 %584 }
  0xb3   :  { %458 = vperm.xlu1 %843, %v983_v15   ;;  %v30_v15 = vsub.s32 1, %v25_v14  ;;  %v180_v54 = vmul.f32 %v178_v8, %v1184_v26 }
  0xb5   :  { %v1190_v29 = vrot.slane %v23_v23, %v30_v15 }
  0xb6   :  { %v1176_v13 = vpop.permute.xlu0 %672 }
  0xb7   :  { %844 = vset.pattern.permute.xlu1 %v891_v7  ;;  %v189_v12 = vpop.permute.xlu1 %188  ;;  %v59_v35 = vmul.f32 %v1094_v39, %v1190_v29  ;;  %v103_v39 = vmul.f32 %v1130_v52, %v1190_v29  ;;  %v147_v52 = vmul.f32 %v145_v62, %v1190_v29 }
  0xb8   :  { %472 = vperm.xlu1 %844, %v790_v10   ;;  %v136_v10 = vmul.f32 %v1148_v59, %v1184_v26 }
  0xbb   :  { %v1179_v22 = vpop.permute.xlu0 %678 }
  0xbc   :  { %485 = vperm.xlu1 %844, %v990_v16   ;;  %v195_v21 = vpop.permute.xlu1 %194 }
  0xbd   :  { %v197_v45 = vmul.f32 %v195_v21, %v1195_v32 }
  0xc0   :  { %845 = vset.pattern.permute.xlu1 %v889_v2  ;;  %v46_v27 = vpop.permute.xlu0 %45 }
  0xc1   :  { %496 = vperm.xlu1 %845, %v990_v16   ;;  %v1188_v28 = vpop.permute.xlu1 %208  ;;  %v48_v30 = vmul.f32 %v46_v27, %v1184_v26 }
  0xc4   :  { %v52_v33 = vpop.permute.xlu0 %51 }
  0xc5   :  { %846 = vset.pattern.permute.xlu1 %v890_v4  ;;  %v222_v34 = vpop.permute.xlu1 %221  ;;  %v54_v36 = vadd.f32 %v52_v33, %v48_v30 }
  0xc6   :  { %502 = vperm.xlu1 %846, %v990_v16   ;;  %v224_v0 = vmul.f32 %v222_v34, %v1184_v26  ;;  %v247_v34 = vmul.f32 %v1124_v50, %v1193_v31 }
  0xc7   :  { %v60_v44 = vadd.f32 %v59_v35, %v54_v36  ;;  %v191_v35 = vmul.f32 %v189_v12, %v1190_v29 }
  0xc8   :  { %v96_v51 = vpop.permute.xlu0 %95 }
  0xc9   :  { %v66_v61 = vadd.f32 %v65_v38, %v60_v44  ;;  %v98_v16 = vadd.f32 %v96_v51, %v92_v41  ;;  %v203_v38 = vmul.f32 %v1118_v48, %v1193_v31 }
  0xca   :  { %847 = vset.pattern.permute.xlu1 %v891_v7  ;;  %v233_v40 = vpop.permute.xlu1 %232 }
  0xcb   :  { %516 = vperm.xlu1 %847, %v793_v46   ;;  %v72_v11 = vadd.f32 %v71_v37, %v66_v61  ;;  %v104_v14 = vadd.f32 %v103_v39, %v98_v16  ;;  %v235_v51 = vmul.f32 %v233_v40, %v1190_v29 }
  0xcc   :  { %v140_v19 = vpop.permute.xlu0 %139 }
  0xcd   :  { %v110_v15 = vadd.f32 %v109_v49, %v104_v14  ;;  %v142_v23 = vadd.f32 %v140_v19, %v136_v10  ;;  %v73_v27 = vmax.f32 %v72_v11, 0.0 }
  0xcf   :  { %529 = vperm.xlu1 %847, %v996_v17   ;;  %v239_v42 = vpop.permute.xlu1 %238  ;;  %v116_v30 = vadd.f32 %v115_v43, %v110_v15  ;;  %v148_v59 = vadd.f32 %v147_v52, %v142_v23  ;;  %v79_v8 = vmul.f32 %v1116_v47, %v73_v27 }
  0xd0   :  { %v184_v33 = vpop.permute.xlu0 %183  ;;  %v241_v47 = vmul.f32 %v239_v42, %v1195_v32 }
  0xd1   :  { %v117_v36 = vmax.f32 %v116_v30, 0.0  ;;  %v154_v62 = vadd.f32 %v153_v25, %v148_v59  ;;  %v186_v37 = vadd.f32 %v184_v33, %v180_v54 }
  0xd3   :  { %848 = vset.pattern.permute.xlu1 %v889_v2  ;;  %v123_v41 = vmul.f32 %v1143_v57, %v117_v36  ;;  %v160_v44 = vadd.f32 %v159_v24, %v154_v62  ;;  %v192_v46 = vadd.f32 %v191_v35, %v186_v37  ;;  %v800_v35 = vld [vmem:[%s1339_s1 + $0x68] sm:$0xff] }
  0xd4   :  { %540 = vperm.xlu1 %848, %v996_v17   ;;  %v253_v12 = vpop.permute.xlu1 %252  ;;  %v228_v39 = vpop.permute.xlu0 %227 }
  0xd5   :  { %v161_v61 = vmax.f32 %v160_v44, 0.0  ;;  %v198_v48 = vadd.f32 %v197_v45, %v192_v46  ;;  %v230_v16 = vadd.f32 %v228_v39, %v224_v0  ;;  %v124_v21 = vadd.f32 %v123_v41, %v79_v8 }
  0xd7   :  { %v167_v43 = vmul.f32 %v1164_v5, %v161_v61  ;;  %v204_v57 = vadd.f32 %v203_v38, %v198_v48  ;;  %v236_v49 = vadd.f32 %v235_v51, %v230_v16 }
  0xd8   :  { %849 = vset.pattern.permute.xlu1 %v890_v4  ;;  %v266_v10 = vpop.permute.xlu1 %265  ;;  %v272_v52 = vpop.permute.xlu0 %271 }
  0xd9   :  { %546 = vperm.xlu1 %849, %v996_v17   ;;  %v205_v40 = vmax.f32 %v204_v57, 0.0  ;;  %v242_v11 = vadd.f32 %v241_v47, %v236_v49  ;;  %v268_v14 = vmul.f32 %v266_v10, %v1184_v26  ;;  %v168_v19 = vadd.f32 %v167_v43, %v124_v21  ;;  %v798_v17 = vld [vmem:[%s1340_s2 + $0x60] sm:$0xff]  ;;  %v804_v43 = vld [vmem:[%s1340_s2 + $0x70] sm:$0xff]  ;;  %v806_v10 = vld [vmem:[%s1339_s1 + $0x78] sm:$0xff] }
  0xdb   :  { %v248_v15 = vadd.f32 %v247_v34, %v242_v11  ;;  %v211_v50 = vmul.f32 %v1188_v28, %v205_v40  ;;  %v274_v24 = vadd.f32 %v272_v52, %v268_v14  ;;  %v291_v28 = vmul.f32 %v1132_v53, %v1193_v31 }
  0xdc   :  { %v316_v41 = vpop.permute.xlu0 %315 }
  0xdd   :  { %850 = vset.pattern.permute.xlu1 %v891_v7  ;;  %v277_v5 = vpop.permute.xlu1 %276  ;;  %v249_v23 = vmax.f32 %v248_v15, 0.0  ;;  %v212_v42 = vadd.f32 %v211_v50, %v168_v19  ;;  %v379_v50 = vmul.f32 %v1140_v56, %v1193_v31 }
  0xde   :  { %v279_v25 = vmul.f32 %v277_v5, %v1190_v29  ;;  %573 = vperm.xlu1 %850, %v1003_v18  }
  0xdf   :  { %v255_v27 = vmul.f32 %v253_v12, %v249_v23  ;;  %v807_v23 = vld [vmem:[%s1340_s2 + $0x78] sm:$0xff] }
  0xe0   :  { %v280_v54 = vadd.f32 %v279_v25, %v274_v24  ;;  %v360_v40 = vpop.permute.xlu0 %359 }
  0xe1   :  { %v256_v59 = vadd.f32 %v255_v27, %v212_v42 }
  0xe2   :  { %579 = vperm.xlu1 %850, %v798_v17   ;;  %v283_v30 = vpop.permute.xlu1 %282 }
  0xe3   :  { %v285_v33 = vmul.f32 %v283_v30, %v1195_v32 }
  0xe5   :  { %v286_v36 = vadd.f32 %v285_v33, %v280_v54 }
  0xe6   :  { %617 = vperm.xlu1 %850, %v800_v35  }
  0xe7   :  { %v297_v62 = vpop.permute.xlu1 %296  ;;  %v292_v37 = vadd.f32 %v291_v28, %v286_v36 }
  0xe9   :  { %v293_v38 = vmax.f32 %v292_v37, 0.0 }
  0xea   :  { %851 = vset.pattern.permute.xlu1 %v890_v4 }
  0xeb   :  { %v299_v45 = vmul.f32 %v297_v62, %v293_v38  ;;  %590 = vperm.xlu1 %851, %v1003_v18   ;;  %v310_v0 = vpop.permute.xlu1 %309  ;;  %v335_v18 = vmul.f32 %v1137_v55, %v1193_v31 }
  0xec   :  { %v312_v53 = vmul.f32 %v310_v0, %v1184_v26 }
  0xed   :  { %v300_v8 = vadd.f32 %v299_v45, %v256_v59  ;;  %v404_v59 = vpop.permute.xlu0 %403 }
  0xee   :  { %v318_v46 = vadd.f32 %v316_v41, %v312_v53 }
  0xef   :  { %852 = vset.pattern.permute.xlu1 %v889_v2 }
  0xf0   :  { %628 = vperm.xlu1 %852, %v800_v35   ;;  %v321_v44 = vpop.permute.xlu1 %320 }
  0xf1   :  { %v323_v12 = vmul.f32 %v321_v44, %v1190_v29  ;;  %v448_v44 = vpop.permute.xlu0 %447 }
  0xf3   :  { %v324_v51 = vadd.f32 %v323_v12, %v318_v46 }
  0xf4   :  { %853 = vset.pattern.permute.xlu1 %v891_v7 }
  0xf5   :  { %661 = vperm.xlu1 %853, %v1015_v20   ;;  %v327_v39 = vpop.permute.xlu1 %326 }
  0xf6   :  { %v329_v61 = vmul.f32 %v327_v39, %v1195_v32 }
  0xf8   :  { %v330_v48 = vadd.f32 %v329_v61, %v324_v51  ;;  %v467_v61 = vmul.f32 %v1151_v60, %v1193_v31  ;;  %v511_v60 = vmul.f32 %v1157_v63, %v1193_v31  ;;  %v555_v63 = vmul.f32 %v1160_v3, %v1193_v31 }
  0xf9   :  { %855 = vset.pattern.permute.xlu1 %v890_v4  ;;  %v599_v3 = vmul.f32 %v1166_v6, %v1193_v31 }
  0xfa   :  { %634 = vperm.xlu1 %855, %v800_v35   ;;  %v341_v16 = vpop.permute.xlu1 %340  ;;  %v336_v21 = vadd.f32 %v335_v18, %v330_v48 }
  0xfc   :  { %v337_v34 = vmax.f32 %v336_v21, 0.0 }
  0xfe   :  { %v343_v47 = vmul.f32 %v341_v16, %v337_v34  ;;  %856 = vset.pattern.permute.xlu1 %v891_v7  ;;  %v354_v57 = vpop.permute.xlu1 %353 }
  0xff   :  { %667 = vperm.xlu1 %856, %v804_v43   ;;  %v356_v55 = vmul.f32 %v354_v57, %v1184_v26 }
 0x100   :  { %v344_v49 = vadd.f32 %v343_v47, %v300_v8 }
 0x101   :  { %v362_v14 = vadd.f32 %v360_v40, %v356_v55 }
 0x103   :  { %705 = vperm.xlu1 %856, %v806_v10   ;;  %v365_v11 = vpop.permute.xlu1 %364 }
 0x104   :  { %v367_v19 = vmul.f32 %v365_v11, %v1190_v29 }
 0x106   :  { %v368_v52 = vadd.f32 %v367_v19, %v362_v14 }
 0x107   :  { %857 = vset.pattern.permute.xlu1 %v888_v1 }
 0x108   :  { %640 = vperm.xlu1 %857, %v800_v35   ;;  %v371_v15 = vpop.permute.xlu1 %370 }
 0x109   :  { %v373_v5 = vmul.f32 %v371_v15, %v1195_v32 }
 0x10b   :  { %v374_v24 = vadd.f32 %v373_v5, %v368_v52 }
 0x10c   :  { %860 = vset.pattern.permute.xlu1 %v891_v7 }
 0x10d   :  { %711 = vperm.xlu1 %860, %v807_v23   ;;  %v385_v25 = vpop.permute.xlu1 %384  ;;  %v380_v42 = vadd.f32 %v379_v50, %v374_v24 }
 0x10f   :  { %v381_v17 = vmax.f32 %v380_v42, 0.0 }
 0x111   :  { %v387_v54 = vmul.f32 %v385_v25, %v381_v17  ;;  %861 = vset.pattern.permute.xlu1 %v889_v2  ;;  %v398_v27 = vpop.permute.xlu1 %397  ;;  %v423_v2 = vmul.f32 %v1145_v58, %v1193_v31 }
 0x112   :  { %716 = vperm.xlu1 %861, %v806_v10   ;;  %v400_v56 = vmul.f32 %v398_v27, %v1184_v26 }
 0x113   :  { %v388_v30 = vadd.f32 %v387_v54, %v344_v49  ;;  %v492_v49 = vpop.permute.xlu0 %491 }
 0x114   :  { %v406_v33 = vadd.f32 %v404_v59, %v400_v56 }
 0x116   :  { %862 = vset.pattern.permute.xlu1 %v888_v1  ;;  %v409_v28 = vpop.permute.xlu1 %408 }
 0x117   :  { %v411_v35 = vmul.f32 %v409_v28, %v1190_v29  ;;  %684 = vperm.xlu1 %862, %v1015_v20   ;;  %v805_v20 = vld [vmem:[%s1341_s3 + $0x70] sm:$0xff]  ;;  %v536_v54 = vpop.permute.xlu0 %535 }
 0x119   :  { %v412_v36 = vadd.f32 %v411_v35, %v406_v33 }
 0x11b   :  { %863 = vset.pattern.permute.xlu1 %v890_v4  ;;  %v415_v62 = vpop.permute.xlu1 %414  ;;  %v624_v33 = vpop.permute.xlu0 %623 }
 0x11c   :  { %v417_v37 = vmul.f32 %v415_v62, %v1195_v32  ;;  %722 = vperm.xlu1 %863, %v806_v10  }
 0x11e   :  { %v418_v38 = vadd.f32 %v417_v37, %v412_v36 }
 0x11f   :  { %v561_v37 = vpop.permute.xlu0 %560 }
 0x120   :  { %864 = vset.pattern.permute.xlu1 %v888_v1  ;;  %v429_v45 = vpop.permute.xlu1 %428  ;;  %v424_v0 = vadd.f32 %v423_v2, %v418_v38 }
 0x121   :  { %728 = vperm.xlu1 %864, %v806_v10  }
 0x122   :  { %v425_v8 = vmax.f32 %v424_v0, 0.0 }
 0x124   :  { %v431_v53 = vmul.f32 %v429_v45, %v425_v8  ;;  %v442_v4 = vpop.permute.xlu1 %441 }
 0x125   :  { %865 = vset.pattern.permute.xlu1 %v891_v7  ;;  %v444_v58 = vmul.f32 %v442_v4, %v1184_v26  ;;  %v587_v4 = vmul.f32 %v1170_v9, %v1190_v29 }
 0x126   :  { %v432_v41 = vadd.f32 %v431_v53, %v388_v30  ;;  %692 = vperm.xlu1 %865, %v805_v20  }
 0x127   :  { %v450_v12 = vadd.f32 %v448_v44, %v444_v58 }
 0x129   :  { %v453_v46 = vpop.permute.xlu1 %452 }
 0x12a   :  { %v455_v1 = vmul.f32 %v453_v46, %v1190_v29 }
 0x12c   :  { %v456_v51 = vadd.f32 %v455_v1, %v450_v12 }
 0x12e   :  { %v459_v39 = vpop.permute.xlu1 %458 }
 0x12f   :  { %v461_v18 = vmul.f32 %v459_v39, %v1195_v32  ;;  %v605_v39 = vpop.permute.xlu0 %604 }
 0x131   :  { %v462_v48 = vadd.f32 %v461_v18, %v456_v51 }
 0x133   :  { %v473_v16 = vpop.permute.xlu1 %472  ;;  %v468_v21 = vadd.f32 %v467_v61, %v462_v48 }
 0x135   :  { %v469_v7 = vmax.f32 %v468_v21, 0.0 }
 0x137   :  { %v475_v34 = vmul.f32 %v473_v16, %v469_v7  ;;  %v486_v43 = vpop.permute.xlu1 %485 }
 0x138   :  { %v488_v57 = vmul.f32 %v486_v43, %v1184_v26 }
 0x139   :  { %v476_v47 = vadd.f32 %v475_v34, %v432_v41 }
 0x13a   :  { %v494_v10 = vadd.f32 %v492_v49, %v488_v57 }
 0x13c   :  { %v497_v55 = vpop.permute.xlu1 %496 }
 0x13d   :  { %v499_v40 = vmul.f32 %v497_v55, %v1190_v29 }
 0x13f   :  { %v500_v11 = vadd.f32 %v499_v40, %v494_v10 }
 0x141   :  { %v503_v14 = vpop.permute.xlu1 %502 }
 0x142   :  { %v505_v19 = vmul.f32 %v503_v14, %v1195_v32 }
 0x144   :  { %v506_v52 = vadd.f32 %v505_v19, %v500_v11  ;;  %v675_v19 = vmul.f32 %v1176_v13, %v1190_v29  ;;  %v649_v13 = vpop.permute.xlu0 %648 }
 0x146   :  { %v517_v15 = vpop.permute.xlu1 %516  ;;  %v512_v50 = vadd.f32 %v511_v60, %v506_v52 }
 0x148   :  { %v513_v5 = vmax.f32 %v512_v50, 0.0 }
 0x14a   :  { %v519_v23 = vmul.f32 %v517_v15, %v513_v5  ;;  %v530_v24 = vpop.permute.xlu1 %529 }
 0x14b   :  { %v532_v42 = vmul.f32 %v530_v24, %v1184_v26  ;;  %v681_v24 = vmul.f32 %v1179_v22, %v1195_v32  ;;  %v737_v22 = vpop.permute.xlu0 %736 }
 0x14c   :  { %v520_v25 = vadd.f32 %v519_v23, %v476_v47 }
 0x14d   :  { %v538_v30 = vadd.f32 %v536_v54, %v532_v42 }
 0x14f   :  { %v541_v17 = vpop.permute.xlu1 %540 }
 0x150   :  { %v543_v27 = vmul.f32 %v541_v17, %v1190_v29 }
 0x152   :  { %v544_v59 = vadd.f32 %v543_v27, %v538_v30 }
 0x154   :  { %v547_v56 = vpop.permute.xlu1 %546 }
 0x155   :  { %v549_v28 = vmul.f32 %v547_v56, %v1195_v32 }
 0x157   :  { %v550_v35 = vadd.f32 %v549_v28, %v544_v59 }
 0x159   :  { %v556_v36 = vadd.f32 %v555_v63, %v550_v35  ;;  %v574_v62 = vpop.permute.xlu1 %573 }
 0x15a   :  { %v576_v8 = vmul.f32 %v574_v62, %v1184_v26 }
 0x15b   :  { %v557_v2 = vmax.f32 %v556_v36, 0.0 }
 0x15d   :  { %v563_v38 = vmul.f32 %v561_v37, %v557_v2  ;;  %v580_v45 = vpop.permute.xlu1 %579 }
 0x15e   :  { %v582_v53 = vadd.f32 %v580_v45, %v576_v8 }
 0x15f   :  { %v564_v0 = vadd.f32 %v563_v38, %v520_v25 }
 0x160   :  { %v588_v58 = vadd.f32 %v587_v4, %v582_v53 }
 0x161   :  { %v618_v20 = vpop.permute.xlu1 %617 }
 0x162   :  { %v620_v43 = vmul.f32 %v618_v20, %v1184_v26 }
 0x164   :  { %v626_v49 = vadd.f32 %v624_v33, %v620_v43 }
 0x166   :  { %v591_v41 = vpop.permute.xlu1 %590 }
 0x167   :  { %v593_v44 = vmul.f32 %v591_v41, %v1195_v32 }
 0x169   :  { %v594_v46 = vadd.f32 %v593_v44, %v588_v58 }
 0x16b   :  { %v600_v12 = vadd.f32 %v599_v3, %v594_v46  ;;  %v629_v1 = vpop.permute.xlu1 %628 }
 0x16c   :  { %v631_v57 = vmul.f32 %v629_v1, %v1190_v29 }
 0x16d   :  { %v601_v51 = vmax.f32 %v600_v12, 0.0 }
 0x16e   :  { %v632_v10 = vadd.f32 %v631_v57, %v626_v49 }
 0x16f   :  { %v607_v18 = vmul.f32 %v605_v39, %v601_v51 }
 0x170   :  { %v662_v61 = vpop.permute.xlu1 %661 }
 0x171   :  { %v608_v48 = vadd.f32 %v607_v18, %v564_v0  ;;  %v664_v6 = vmul.f32 %v662_v61, %v1184_v26 }
 0x175   :  { %v635_v16 = vpop.permute.xlu1 %634 }
 0x176   :  { %v637_v55 = vmul.f32 %v635_v16, %v1195_v32 }
 0x178   :  { %v638_v60 = vadd.f32 %v637_v55, %v632_v10 }
 0x17a   :  { %v668_v21 = vpop.permute.xlu1 %667 }
 0x17b   :  { %v670_v40 = vadd.f32 %v668_v21, %v664_v6 }
 0x17d   :  { %v676_v52 = vadd.f32 %v675_v19, %v670_v40 }
 0x17e   :  { %v706_v7 = vpop.permute.xlu1 %705 }
 0x17f   :  { %v708_v50 = vmul.f32 %v706_v7, %v1184_v26  ;;  %v682_v27 = vadd.f32 %v681_v24, %v676_v52 }
 0x183   :  { %v641_v34 = vpop.permute.xlu1 %640 }
 0x184   :  { %v643_v11 = vmul.f32 %v641_v34, %v1193_v31 }
 0x186   :  { %v644_v15 = vadd.f32 %v643_v11, %v638_v60 }
 0x188   :  { %v712_v9 = vpop.permute.xlu1 %711  ;;  %v645_v54 = vmax.f32 %v644_v15, 0.0 }
 0x189   :  { %v714_v42 = vadd.f32 %v712_v9, %v708_v50 }
 0x18a   :  { %v651_v33 = vmul.f32 %v649_v13, %v645_v54 }
 0x18c   :  { %v652_v62 = vadd.f32 %v651_v33, %v608_v48 }
 0x18d   :  { %v717_v47 = vpop.permute.xlu1 %716 }
 0x18e   :  { %v719_v5 = vmul.f32 %v717_v47, %v1190_v29 }
 0x190   :  { %v720_v30 = vadd.f32 %v719_v5, %v714_v42 }
 0x192   :  { %v685_v14 = vpop.permute.xlu1 %684 }
 0x193   :  { %v687_v25 = vmul.f32 %v685_v14, %v1193_v31 }
 0x195   :  { %v688_v56 = vadd.f32 %v687_v25, %v682_v27 }
 0x197   :  { %v723_v23 = vpop.permute.xlu1 %722  ;;  %v689_v63 = vmax.f32 %v688_v56, 0.0 }
 0x198   :  { %v725_v17 = vmul.f32 %v723_v23, %v1195_v32 }
 0x19a   :  { %v726_v28 = vadd.f32 %v725_v17, %v720_v30 }
 0x19c   :  { %v729_v59 = vpop.permute.xlu1 %728 }
 0x19d   :  { %v731_v26 = vmul.f32 %v729_v59, %v1193_v31  ;;  %v747_v31 = vstv %s1342_s4 }
 0x19f   :  { %v732_v29 = vadd.f32 %v731_v26, %v726_v28 }
 0x1a1   :  { %v733_v35 = vmax.f32 %v732_v29, 0.0  ;;  %v693_v36 = vpop.permute.xlu1 %692 }
 0x1a2   :  { %v695_v2 = vmul.f32 %v693_v36, %v689_v63 }
 0x1a3   :  { %v739_v37 = vmul.f32 %v737_v22, %v733_v35 }
 0x1a4   :  { %v696_v38 = vadd.f32 %v695_v2, %v652_v62 }
 0x1a6   :  { %v740_v32 = vadd.f32 %v739_v37, %v696_v38 }
 0x1a8   :  { %v741_v45 = vrot.slane %v740_v32, 4 }
 0x1aa   :  { %v742_v0 = vadd.f32 %v741_v45, %v740_v32 }
 0x1ac   :  { %v743_v8 = vrot.slane %v742_v0, 2 }
 0x1ae   :  { %v744_v20 = vadd.f32 %v743_v8, %v742_v0 }
 0x1b0   :  { %v745_v53 = vrot.slane %v744_v20, 1 }
 0x1b2   :  { %v746_v4 = vadd.f32 %v745_v53, %v744_v20 }
 0x1b4   :  { %v748_v41 = vadd.f32 %v747_v31, %v746_v4 }
 0x1b6   :  { %749 = vst [vmem:[#allocation3] sm:$0x1] %v748_v41 }
 0x1b7   :  { %877 = shalt.err (!%p874_p4)
}
 0x1b8   :  { %759 = dma.vmem_to_hbm [thread:$0]  %s757_s15, 16, %s1343_s5, [#allocation4]  }
 0x1b9   :  { %886 = dma.done.wait [#allocation4], 16  }
 0x1ba   :  { %887 = vsyncadd [#allocation4], 4294967280 }
 0x1bb   :  { %763 = vsyncpa [#allocation4], 1 }

</bundles_post_ra>
